<compile_context>
chip_gen: v7x
topology: tpu7x:2x2x1
jax: 0.10.0
libtpu: 0.0.40
codegen_flags: <defaults>
</compile_context>

<pallas_src>
import jax
import jax.numpy as jnp
from jax import lax
from jax.experimental import pallas as pl
from jax.experimental.pallas import tpu as pltpu


# ----------------------------------------------------------------------------
# Fused Pallas kernel: stem matmul+swish -> 1x1 matmul+swish -> GAP -> head,
# for a pack of Bt images per grid step.  Everything stays in VMEM.
# ----------------------------------------------------------------------------
def _fused_fcnn_kernel(p_ref, sw_ref, pw_ref, b2_ref, pool_ref, hw_ref, o_ref):
    """One batch-pack (Bt images) per grid step.

    p_ref   : (Bt*S, Kp)  im2col patches, Bt images stacked along sublanes.
                          Column K holds 1.0 (stem-bias fold), cols K+1.. = 0.
    sw_ref  : (Kp, Cs)    stem weight; row K = stem bias, rows K+1.. = 0.
    pw_ref  : (Cs, Cf)    1x1 expansion weight.
    b2_ref  : (2, 128)    packed biases: row 0[:Cf] = proj bias,
                          row 1 = head bias zero-padded to 128 lanes.
    pool_ref: (Bt, Bt*S)  block-diagonal mean-pool matrix (1/S in image i cols).
    hw_ref  : (Cf, 128)   head weight zero-padded to 128 output lanes.
    o_ref   : (Bt, 128)   one image per sublane row; cols 0:2 are the result.
    """
    c_feat = pw_ref.shape[1]
    b2 = b2_ref[...]

    # Stem 3x3/s2 conv: single (Bt*S, Kp) x (Kp, Cs) MXU matmul, bias folded in.
    h = jnp.dot(p_ref[...], sw_ref[...], preferred_element_type=jnp.float32)
    h = h * jax.nn.sigmoid(h)                                   # swish (Bt*S, Cs)

    # 1x1 expansion conv.
    f = jnp.dot(h, pw_ref[...],
                preferred_element_type=jnp.float32) + b2[0:1, :c_feat]
    f = f * jax.nn.sigmoid(f)                                   # swish (Bt*S, Cf)

    # Per-image global average pool as an MXU matmul (rides the MXU slot
    # instead of the XLU sublane-reduce path).
    gap = jnp.dot(pool_ref[...], f,
                  preferred_element_type=jnp.float32)           # (Bt, Cf)

    # Head 1x1 conv to 2 classes, padded to 128 lanes: full unmasked
    # lane/sublane-dense (Bt, 128) store, one image per sublane row.
    o_ref[...] = jnp.dot(gap, hw_ref[...],
                         preferred_element_type=jnp.float32) + b2[1:2, :]


# ----------------------------------------------------------------------------
# JAX glue: patch extraction, parameters, wrapper, reference
# ----------------------------------------------------------------------------
def _extract_patches(x_nchw, Ho, Wo):
    """im2col for a 3x3 / stride-2 / pad-1 conv.

    Returns (B, Ho*Wo, Cin*9) with features in channel-major (c, kh, kw) order
    (== PyTorch F.unfold / Conv2d weight.reshape(out, -1)).  Built from strided
    shifted slices of the NHWC input, so there is NO transpose over the
    K-inflated im2col tensor — only the small raw input is transposed.
    """
    B, C, H, W = x_nchw.shape
    x_nhwc = jnp.transpose(x_nchw, (0, 2, 3, 1))
    xp = jnp.pad(x_nhwc, ((0, 0), (1, 1), (1, 1), (0, 0)))
    taps = []
    for di in range(3):
        for dj in range(3):
            taps.append(xp[:, di:di + 2 * Ho:2, dj:dj + 2 * Wo:2, :])  # (B,Ho,Wo,C)
    # stack on a NEW last axis -> (B, Ho, Wo, C, 9) -> feature = c*9 + (di*3+dj)
    patches = jnp.stack(taps, axis=-1).reshape(B, Ho * Wo, C * 9)
    return patches


def init_params(c_in=3, c_stem=8, c_feat=32):
    """Deterministic parameter init (PyTorch conv-weight shapes)."""
    key = jax.random.PRNGKey(42)
    ks = jax.random.split(key, 6)
    return {
        "stem_w": 0.1 * jax.random.normal(ks[0], (c_stem, c_in, 3, 3), jnp.float32),
        "stem_b": 0.1 * jax.random.normal(ks[1], (c_stem,), jnp.float32),
        "proj_w": 0.1 * jax.random.normal(ks[2], (c_feat, c_stem, 1, 1), jnp.float32),
        "proj_b": 0.1 * jax.random.normal(ks[3], (c_feat,), jnp.float32),
        # head: nn.Conv2d(in_channels=c_feat, out_channels=2, kernel_size=1)
        "head_w": 0.1 * jax.random.normal(ks[4], (2, c_feat, 1, 1), jnp.float32),
        "head_b": 0.1 * jax.random.normal(ks[5], (2,), jnp.float32),
    }


def efficientnet_fcnn_forward(x, params, bt=8):
    """x: (B, 3, H, W) NCHW -> (B, 2, 1, 1).  bt = images packed per grid step."""
    B, C, H, W = x.shape
    c_stem = params["stem_w"].shape[0]
    c_feat = params["proj_w"].shape[0]

    Ho = (H + 2 - 3) // 2 + 1
    Wo = (W + 2 - 3) // 2 + 1
    S = Ho * Wo
    K = C * 9
    Kp = ((K + 1 + 7) // 8) * 8          # + ones column (stem-bias fold), pad to x8

    patches = _extract_patches(x, Ho, Wo)                      # (B, S, K)

    # Pack bt images per grid step: pad batch, append the bias/ones column.
    nb = -(-B // bt)
    B_pad = nb * bt
    pat = jnp.zeros((B_pad, S, Kp), jnp.float32)
    pat = pat.at[:B, :, :K].set(patches)
    pat = pat.at[:, :, K].set(1.0)                             # stem-bias fold column
    pat = pat.reshape(B_pad * S, Kp)                           # contiguous merge (free)

    # Weights with channels on the lane (last) axis; stem bias folded into row K.
    sw = jnp.zeros((Kp, c_stem), jnp.float32)
    sw = sw.at[:K, :].set(params["stem_w"].reshape(c_stem, K).T)
    sw = sw.at[K, :].set(params["stem_b"])
    pw = params["proj_w"].reshape(c_feat, c_stem).T            # (c_stem, c_feat)

    # Packed proj/head biases and lane-padded head weight (unmasked output store).
    b2 = jnp.zeros((2, 128), jnp.float32)
    b2 = b2.at[0, :c_feat].set(params["proj_b"])
    b2 = b2.at[1, :2].set(params["head_b"])
    hw = jnp.zeros((c_feat, 128), jnp.float32)
    hw = hw.at[:, :2].set(params["head_w"].reshape(2, c_feat).T)

    # Block-diagonal per-image mean-pool matrix: row i has 1/S over image i's rows.
    pool = jnp.repeat(jnp.eye(bt, dtype=jnp.float32), S, axis=1) / float(S)  # (bt,bt*S)

    out_pad = pl.pallas_call(
        _fused_fcnn_kernel,
        out_shape=jax.ShapeDtypeStruct((B_pad, 128), jnp.float32),
        grid=(nb,),
        in_specs=[
            pl.BlockSpec((bt * S, Kp), lambda b: (b, 0)),      # patch pack (per step)
            pl.BlockSpec((Kp, c_stem), lambda b: (0, 0)),      # stem W+bias (resident)
            pl.BlockSpec((c_stem, c_feat), lambda b: (0, 0)),  # proj W      (resident)
            pl.BlockSpec((2, 128), lambda b: (0, 0)),          # packed biases
            pl.BlockSpec((bt, bt * S), lambda b: (0, 0)),      # GAP pool matrix
            pl.BlockSpec((c_feat, 128), lambda b: (0, 0)),     # head W (lane-padded)
        ],
        out_specs=pl.BlockSpec((bt, 128), lambda b: (b, 0)),
        compiler_params=pltpu.CompilerParams(
            dimension_semantics=("parallel",)),
    )(pat, sw, pw, b2, pool, hw)

    return out_pad[:B, :2].reshape(B, 2, 1, 1)


def _reference_forward(x, params):
    """Pure-JAX reference with real convolutions (PyTorch Conv2d semantics)."""
    hp = lax.Precision.HIGHEST
    B = x.shape[0]
    c_feat = params["proj_w"].shape[0]
    h = lax.conv_general_dilated(x, params["stem_w"], (2, 2), ((1, 1), (1, 1)),
                                 dimension_numbers=("NCHW", "OIHW", "NCHW"),
                                 precision=hp)
    h = h + params["stem_b"][None, :, None, None]
    h = h * jax.nn.sigmoid(h)
    f = lax.conv_general_dilated(h, params["proj_w"], (1, 1), "VALID",
                                 dimension_numbers=("NCHW", "OIHW", "NCHW"),
                                 precision=hp)
    f = f + params["proj_b"][None, :, None, None]
    f = f * jax.nn.sigmoid(f)
    gap = f.mean(axis=(2, 3))                                  # global average pool
    out = jnp.dot(gap, params["head_w"].reshape(2, c_feat).T,
                  precision=hp) + params["head_b"]
    return out.reshape(B, 2, 1, 1)


if __name__ == "__main__":
    key = jax.random.PRNGKey(0)
    x = jax.random.normal(key, (2, 3, 16, 16), dtype=jnp.float32)   # NCHW
    params = init_params()

    out = efficientnet_fcnn_forward(x, params)
    out = jax.block_until_ready(out)

    ref = _reference_forward(x, params)
    assert out.shape == (2, 2, 1, 1), out.shape
    assert jnp.allclose(out, ref, atol=1e-3, rtol=1e-3), \
        float(jnp.max(jnp.abs(out - ref)))
    print("KERNEL_OK")
</pallas_src>

<mosaic_0001>
module attributes {stable_mosaic.version = 11 : i64} {
  func.func @_fused_fcnn_kernel(%arg0: i32, %arg1: memref<512x32xf32, #tpu.memory_space<vmem>>, %arg2: memref<32x8xf32, #tpu.memory_space<vmem>>, %arg3: memref<8x32xf32, #tpu.memory_space<vmem>>, %arg4: memref<2x128xf32, #tpu.memory_space<vmem>>, %arg5: memref<8x512xf32, #tpu.memory_space<vmem>>, %arg6: memref<32x128xf32, #tpu.memory_space<vmem>>, %arg7: memref<8x128xf32, #tpu.memory_space<vmem>>) attributes {dimension_semantics = [#tpu.dimension_semantics<parallel>], iteration_bounds = array<i64: 1>, scalar_prefetch = 0 : i64, scratch_operands = 0 : i64, tpu.core_type = #tpu.core_type<tc>, window_params = [{transform_indices = @transform_0, window_bounds = array<i64: 512, 32>}, {pipeline_mode = #tpu.pipeline_mode<synchronous>, transform_indices = @transform_1, window_bounds = array<i64: 32, 8>}, {pipeline_mode = #tpu.pipeline_mode<synchronous>, transform_indices = @transform_2, window_bounds = array<i64: 8, 32>}, {pipeline_mode = #tpu.pipeline_mode<synchronous>, transform_indices = @transform_3, window_bounds = array<i64: 2, 128>}, {pipeline_mode = #tpu.pipeline_mode<synchronous>, transform_indices = @transform_4, window_bounds = array<i64: 8, 512>}, {pipeline_mode = #tpu.pipeline_mode<synchronous>, transform_indices = @transform_5, window_bounds = array<i64: 32, 128>}, {transform_indices = @transform_6, window_bounds = array<i64: 8, 128>}]} {
    %c0 = arith.constant 0 : index
    %c0_0 = arith.constant 0 : index
    %0 = vector.load %arg4[%c0, %c0_0] : memref<2x128xf32, #tpu.memory_space<vmem>>, vector<2x128xf32>
    %c0_1 = arith.constant 0 : index
    %c0_2 = arith.constant 0 : index
    %1 = vector.load %arg1[%c0_1, %c0_2] : memref<512x32xf32, #tpu.memory_space<vmem>>, vector<512x32xf32>
    %c0_3 = arith.constant 0 : index
    %c0_4 = arith.constant 0 : index
    %2 = vector.load %arg2[%c0_3, %c0_4] : memref<32x8xf32, #tpu.memory_space<vmem>>, vector<32x8xf32>
    %cst = arith.constant dense<0.000000e+00> : vector<512x8xf32>
    %3 = tpu.matmul %1, %2, %cst {dimension_numbers = #tpu.dot_dimension_numbers<[1], [0], [0], [1], [0, 0, 1, 1], [], []>} : vector<512x32xf32>, vector<32x8xf32>, vector<512x8xf32> -> vector<512x8xf32>
    %4 = arith.negf %3 : vector<512x8xf32>
    %5 = math.exp %4 : vector<512x8xf32>
    %cst_5 = arith.constant 1.000000e+00 : f32
    %6 = vector.broadcast %cst_5 : f32 to vector<512x8xf32>
    %7 = arith.addf %6, %5 : vector<512x8xf32>
    %8 = arith.divf %6, %7 : vector<512x8xf32>
    %9 = arith.mulf %3, %8 : vector<512x8xf32>
    %c0_6 = arith.constant 0 : index
    %c0_7 = arith.constant 0 : index
    %10 = vector.load %arg3[%c0_6, %c0_7] : memref<8x32xf32, #tpu.memory_space<vmem>>, vector<8x32xf32>
    %cst_8 = arith.constant dense<0.000000e+00> : vector<512x32xf32>
    %11 = tpu.matmul %9, %10, %cst_8 {dimension_numbers = #tpu.dot_dimension_numbers<[1], [0], [0], [1], [0, 0, 1, 1], [], []>} : vector<512x8xf32>, vector<8x32xf32>, vector<512x32xf32> -> vector<512x32xf32>
    %12 = vector.extract_strided_slice %0 {offsets = [0, 0], sizes = [1, 32], strides = [1, 1]} : vector<2x128xf32> to vector<1x32xf32>
    %13 = vector.broadcast %12 : vector<1x32xf32> to vector<512x32xf32>
    %14 = arith.addf %11, %13 : vector<512x32xf32>
    %15 = arith.negf %14 : vector<512x32xf32>
    %16 = math.exp %15 : vector<512x32xf32>
    %cst_9 = arith.constant 1.000000e+00 : f32
    %17 = vector.broadcast %cst_9 : f32 to vector<512x32xf32>
    %18 = arith.addf %17, %16 : vector<512x32xf32>
    %19 = arith.divf %17, %18 : vector<512x32xf32>
    %20 = arith.mulf %14, %19 : vector<512x32xf32>
    %c0_10 = arith.constant 0 : index
    %c0_11 = arith.constant 0 : index
    %21 = vector.load %arg5[%c0_10, %c0_11] : memref<8x512xf32, #tpu.memory_space<vmem>>, vector<8x512xf32>
    %cst_12 = arith.constant dense<0.000000e+00> : vector<8x32xf32>
    %22 = tpu.matmul %21, %20, %cst_12 {dimension_numbers = #tpu.dot_dimension_numbers<[1], [0], [0], [1], [0, 0, 1, 1], [], []>} : vector<8x512xf32>, vector<512x32xf32>, vector<8x32xf32> -> vector<8x32xf32>
    %c0_13 = arith.constant 0 : index
    %c0_14 = arith.constant 0 : index
    %23 = vector.load %arg6[%c0_13, %c0_14] : memref<32x128xf32, #tpu.memory_space<vmem>>, vector<32x128xf32>
    %cst_15 = arith.constant dense<0.000000e+00> : vector<8x128xf32>
    %24 = tpu.matmul %22, %23, %cst_15 {dimension_numbers = #tpu.dot_dimension_numbers<[1], [0], [0], [1], [0, 0, 1, 1], [], []>} : vector<8x32xf32>, vector<32x128xf32>, vector<8x128xf32> -> vector<8x128xf32>
    %25 = vector.extract_strided_slice %0 {offsets = [1, 0], sizes = [1, 128], strides = [1, 1]} : vector<2x128xf32> to vector<1x128xf32>
    %26 = vector.broadcast %25 : vector<1x128xf32> to vector<8x128xf32>
    %27 = arith.addf %24, %26 : vector<8x128xf32>
    %c0_16 = arith.constant 0 : index
    %c0_17 = arith.constant 0 : index
    %28 = vector.load %arg7[%c0_16, %c0_17] : memref<8x128xf32, #tpu.memory_space<vmem>>, vector<8x128xf32>
    tpu.vector_store %arg7[%c0_16, %c0_17], %27 {strides = array<i32>} : memref<8x128xf32, #tpu.memory_space<vmem>>, vector<8x128xf32>,
    return
  }
  func.func @transform_0(%arg0: i32) -> (i32, i32) {
    %c0_i32 = arith.constant 0 : i32
    %c0_i32_0 = arith.constant 0 : i32
    return %arg0, %c0_i32 : i32, i32
  }
  func.func @transform_1(%arg0: i32) -> (i32, i32) {
    %c0_i32 = arith.constant 0 : i32
    %c0_i32_0 = arith.constant 0 : i32
    %c0_i32_1 = arith.constant 0 : i32
    return %c0_i32, %c0_i32_0 : i32, i32
  }
  func.func @transform_2(%arg0: i32) -> (i32, i32) {
    %c0_i32 = arith.constant 0 : i32
    %c0_i32_0 = arith.constant 0 : i32
    %c0_i32_1 = arith.constant 0 : i32
    return %c0_i32, %c0_i32_0 : i32, i32
  }
  func.func @transform_3(%arg0: i32) -> (i32, i32) {
    %c0_i32 = arith.constant 0 : i32
    %c0_i32_0 = arith.constant 0 : i32
    %c0_i32_1 = arith.constant 0 : i32
    return %c0_i32, %c0_i32_0 : i32, i32
  }
  func.func @transform_4(%arg0: i32) -> (i32, i32) {
    %c0_i32 = arith.constant 0 : i32
    %c0_i32_0 = arith.constant 0 : i32
    %c0_i32_1 = arith.constant 0 : i32
    return %c0_i32, %c0_i32_0 : i32, i32
  }
  func.func @transform_5(%arg0: i32) -> (i32, i32) {
    %c0_i32 = arith.constant 0 : i32
    %c0_i32_0 = arith.constant 0 : i32
    %c0_i32_1 = arith.constant 0 : i32
    return %c0_i32, %c0_i32_0 : i32, i32
  }
  func.func @transform_6(%arg0: i32) -> (i32, i32) {
    %c0_i32 = arith.constant 0 : i32
    %c0_i32_0 = arith.constant 0 : i32
    return %arg0, %c0_i32 : i32, i32
  }
}

</mosaic_0001>

<bundles_post_ra>
// kernel: tpu_custom_call.1
= control target key start
LH: loop header
LB: loop body
LE: loop exit
PB: predicated region body
PF: predicated region fallthrough
CT: control target
= control target key end

     0   :  { %vm93_vm0 = vcmask 261120   ;;  %s4830_s0 = inlined_call_operand.vmem [shape: f32[512,32], index: 0, kind: input, shape index: {}]   ;;  %s4831_s1 = inlined_call_operand.vmem [shape: f32[32,8], index: 1, kind: input, shape index: {}]   ;;  %s4832_s2 = inlined_call_operand.vmem [shape: f32[8,32], index: 2, kind: input, shape index: {}]   ;;  %s4833_s3 = inlined_call_operand.vmem [shape: f32[2,128], index: 3, kind: input, shape index: {}]   ;;  %s4834_s4 = inlined_call_operand.vmem [shape: f32[8,512], index: 4, kind: input, shape index: {}]   ;;  %s4835_s5 = inlined_call_operand.vmem [shape: f32[32,128], index: 5, kind: input, shape index: {}]   ;;  %s4836_s6 = inlined_call_operand.hbm [shape: f32[8,128], index: 6, kind: output, shape index: {}]  }
   0x1   :  { %v89_v0 = vld [vmem:[%s4831_s1] sm:$0xff]  ;;  %v90_v1 = vld [vmem:[%s4831_s1 + $0x8] sm:$0xff]  ;;  %v91_v2 = vld [vmem:[%s4831_s1 + $0x10] sm:$0xff] }
   0x2   :  { %v3068_v3 = vpack.c.bf16 %v90_v1, %v89_v0  ;;  %v92_v4 = vld [vmem:[%s4831_s1 + $0x18] sm:$0xff]  ;;  %v25_v5 = vld [vmem:[%s4830_s0] sm:$0xff]  ;;  %v26_v7 = vld [vmem:[%s4830_s0 + $0x8] sm:$0xff] }
   0x3   :  { %v3072_v6 = vpack.c.bf16 %v92_v4, %v91_v2  ;;  %2863 = vmatprep.mubr.msk.f32.mxu0 %vm93_vm0, %v25_v5  ;;  %v27_v8 = vld [vmem:[%s4830_s0 + $0x10] sm:$0xff]  ;;  %v28_v9 = vld [vmem:[%s4830_s0 + $0x18] sm:$0xff]  ;;  %v29_v10 = vld [vmem:[%s4830_s0 + $0x20] sm:$0xff] }
   0x4   :  { %3069 = vmatprep.subr.bf16.mxu0 %v3068_v3  ;;  %v30_v11 = vld [vmem:[%s4830_s0 + $0x28] sm:$0xff]  ;;  %v31_v12 = vld [vmem:[%s4830_s0 + $0x30] sm:$0xff]  ;;  %v32_v13 = vld [vmem:[%s4830_s0 + $0x38] sm:$0xff] }
   0x5   :  { %3071 = vmatpush3.bf16.msra.mxu0 %v3068_v3  ;;  %v33_v14 = vld [vmem:[%s4830_s0 + $0x40] sm:$0xff] }
   0x6   :  { %3073 = vmatprep.subr.bf16.mxu0 %v3072_v6 }
   0x9   :  { %3075 = vmatpush3.bf16.msra.mxu0 %v3072_v6 }
   0xc   :  { %2864 = vmatmul.mubr.msk.f32.vlgmr.msra.gmra.mrb[0].mxu0 %vm93_vm0, %v26_v7 }
   0xd   :  { %2866 = vmatprep.mubr.msk.f32.mxu0 %vm93_vm0, %v27_v8 }
  0x10   :  { %2867 = vmatmul.mubr.msk.f32.gmra.mrb[2].mxu0 %vm93_vm0, %v28_v9 }
  0x11   :  { %2869 = vmatprep.mubr.msk.f32.mxu0 %vm93_vm0, %v29_v10 }
  0x14   :  { %2870 = vmatmul.mubr.msk.f32.gmra.mrb[4].mxu0 %vm93_vm0, %v30_v11 }
  0x15   :  { %2872 = vmatprep.mubr.msk.f32.mxu0 %vm93_vm0, %v31_v12 }
  0x16   :  { %11 = vsyncpa [#allocation3], 0  ;;  %v34_v15 = vld [vmem:[%s4830_s0 + $0x48] sm:$0xff]  ;;  %v35_v16 = vld [vmem:[%s4830_s0 + $0x50] sm:$0xff]  ;;  %vm1124_vm1 = vcmask 64512   ;;  %vm3688_vm2 = vmmov 0  }
  0x17   :  { %v36_v17 = vld [vmem:[%s4830_s0 + $0x58] sm:$0xff]  ;;  %v37_v18 = vld [vmem:[%s4830_s0 + $0x60] sm:$0xff]  ;;  %v38_v19 = vld [vmem:[%s4830_s0 + $0x68] sm:$0xff] }
  0x18   :  { %2873 = vmatmul.mubr.msk.f32.gmra.mrb[6].mxu0 %vm93_vm0, %v32_v13  ;;  %v39_v20 = vld [vmem:[%s4830_s0 + $0x70] sm:$0xff]  ;;  %v40_v21 = vld [vmem:[%s4830_s0 + $0x78] sm:$0xff]  ;;  %v41_v22 = vld [vmem:[%s4830_s0 + $0x80] sm:$0xff] }
  0x19   :  { %2875 = vmatprep.mubr.msk.f32.mxu0 %vm93_vm0, %v33_v14  ;;  %v42_v23 = vld [vmem:[%s4830_s0 + $0x88] sm:$0xff]  ;;  %v43_v24 = vld [vmem:[%s4830_s0 + $0x90] sm:$0xff]  ;;  %v44_v25 = vld [vmem:[%s4830_s0 + $0x98] sm:$0xff] }
  0x1a   :  { %v45_v26 = vld [vmem:[%s4830_s0 + $0xa0] sm:$0xff]  ;;  %v46_v27 = vld [vmem:[%s4830_s0 + $0xa8] sm:$0xff]  ;;  %v47_v28 = vld [vmem:[%s4830_s0 + $0xb0] sm:$0xff] }
  0x1b   :  { %v48_v29 = vld [vmem:[%s4830_s0 + $0xb8] sm:$0xff]  ;;  %v49_v30 = vld [vmem:[%s4830_s0 + $0xc0] sm:$0xff]  ;;  %v50_v31 = vld [vmem:[%s4830_s0 + $0xc8] sm:$0xff] }
  0x1c   :  { %2876 = vmatmul.mubr.msk.f32.gmra.mrb[8].mxu0 %vm93_vm0, %v34_v15  ;;  %v51_v32 = vld [vmem:[%s4830_s0 + $0xd0] sm:$0xff]  ;;  %v52_v33 = vld [vmem:[%s4830_s0 + $0xd8] sm:$0xff]  ;;  %v53_v34 = vld [vmem:[%s4830_s0 + $0xe0] sm:$0xff] }
  0x1d   :  { %2878 = vmatprep.mubr.msk.f32.mxu0 %vm93_vm0, %v35_v16  ;;  %v54_v35 = vld [vmem:[%s4830_s0 + $0xe8] sm:$0xff]  ;;  %v55_v36 = vld [vmem:[%s4830_s0 + $0xf0] sm:$0xff]  ;;  %v56_v37 = vld [vmem:[%s4830_s0 + $0xf8] sm:$0xff] }
  0x1e   :  { %v57_v38 = vld [vmem:[%s4830_s0 + $0x100] sm:$0xff]  ;;  %v58_v39 = vld [vmem:[%s4830_s0 + $0x108] sm:$0xff]  ;;  %v59_v40 = vld [vmem:[%s4830_s0 + $0x110] sm:$0xff] }
  0x1f   :  { %v60_v41 = vld [vmem:[%s4830_s0 + $0x118] sm:$0xff]  ;;  %v61_v42 = vld [vmem:[%s4830_s0 + $0x120] sm:$0xff]  ;;  %v62_v43 = vld [vmem:[%s4830_s0 + $0x128] sm:$0xff] }
  0x20   :  { %2879 = vmatmul.mubr.msk.f32.gmra.mrb[10].mxu0 %vm93_vm0, %v36_v17  ;;  %v63_v44 = vld [vmem:[%s4830_s0 + $0x130] sm:$0xff]  ;;  %v64_v45 = vld [vmem:[%s4830_s0 + $0x138] sm:$0xff]  ;;  %v65_v46 = vld [vmem:[%s4830_s0 + $0x140] sm:$0xff] }
  0x21   :  { %2881 = vmatprep.mubr.msk.f32.mxu0 %vm93_vm0, %v37_v18  ;;  %v66_v47 = vld [vmem:[%s4830_s0 + $0x148] sm:$0xff]  ;;  %v67_v48 = vld [vmem:[%s4830_s0 + $0x150] sm:$0xff]  ;;  %v68_v49 = vld [vmem:[%s4830_s0 + $0x158] sm:$0xff] }
  0x22   :  { %v69_v50 = vld [vmem:[%s4830_s0 + $0x160] sm:$0xff]  ;;  %v70_v51 = vld [vmem:[%s4830_s0 + $0x168] sm:$0xff]  ;;  %v71_v52 = vld [vmem:[%s4830_s0 + $0x170] sm:$0xff] }
  0x23   :  { %v72_v53 = vld [vmem:[%s4830_s0 + $0x178] sm:$0xff]  ;;  %v73_v54 = vld [vmem:[%s4830_s0 + $0x180] sm:$0xff]  ;;  %v74_v55 = vld [vmem:[%s4830_s0 + $0x188] sm:$0xff] }
  0x24   :  { %2882 = vmatmul.mubr.msk.f32.gmra.mrb[12].mxu0 %vm93_vm0, %v38_v19  ;;  %v75_v56 = vld [vmem:[%s4830_s0 + $0x190] sm:$0xff]  ;;  %v76_v57 = vld [vmem:[%s4830_s0 + $0x198] sm:$0xff]  ;;  %v77_v58 = vld [vmem:[%s4830_s0 + $0x1a0] sm:$0xff] }
  0x25   :  { %2884 = vmatprep.mubr.msk.f32.mxu0 %vm93_vm0, %v39_v20  ;;  %v78_v59 = vld [vmem:[%s4830_s0 + $0x1a8] sm:$0xff]  ;;  %v79_v60 = vld [vmem:[%s4830_s0 + $0x1b0] sm:$0xff]  ;;  %v80_v61 = vld [vmem:[%s4830_s0 + $0x1b8] sm:$0xff] }
  0x26   :  { %v81_v62 = vld [vmem:[%s4830_s0 + $0x1c0] sm:$0xff]  ;;  %v82_v63 = vld [vmem:[%s4830_s0 + $0x1c8] sm:$0xff]  ;;  %v83_v0 = vld [vmem:[%s4830_s0 + $0x1d0] sm:$0xff] }
  0x27   :  { %v84_v1 = vld [vmem:[%s4830_s0 + $0x1d8] sm:$0xff]  ;;  %v1119_v2 = vld [vmem:[%s4832_s2] sm:$0xff]  ;;  %v86_v4 = vld [vmem:[%s4830_s0 + $0x1e8] sm:$0xff] }
  0x28   :  { %2885 = vmatmul.mubr.msk.f32.gmra.mrb[14].mxu0 %vm93_vm0, %v40_v21  ;;  %v85_v3 = vld [vmem:[%s4830_s0 + $0x1e0] sm:$0xff]  ;;  %2959 = vmatprep.subr.mxu1 %v1119_v2  ;;  %v87_v5 = vld [vmem:[%s4830_s0 + $0x1f0] sm:$0xff]  ;;  %v88_v6 = vld [vmem:[%s4830_s0 + $0x1f8] sm:$0xff] }
  0x29   :  { %2887 = vmatprep.mubr.msk.f32.mxu0 %vm93_vm0, %v41_v22  ;;  %2960 = vmatpush3.msra.mxu1 %v1119_v2 }
  0x2c   :  { %2888 = vmatmul.mubr.msk.f32.gmra.mrb[16].mxu0 %vm93_vm0, %v42_v23 }
  0x2d   :  { %2890 = vmatprep.mubr.msk.f32.mxu0 %vm93_vm0, %v43_v24 }
  0x30   :  { %2891 = vmatmul.mubr.msk.f32.gmra.mrb[18].mxu0 %vm93_vm0, %v44_v25 }
  0x31   :  { %2893 = vmatprep.mubr.msk.f32.mxu0 %vm93_vm0, %v45_v26 }
  0x34   :  { %2894 = vmatmul.mubr.msk.f32.gmra.mrb[20].mxu0 %vm93_vm0, %v46_v27 }
  0x35   :  { %2896 = vmatprep.mubr.msk.f32.mxu0 %vm93_vm0, %v47_v28 }
  0x38   :  { %2897 = vmatmul.mubr.msk.f32.gmra.mrb[22].mxu0 %vm93_vm0, %v48_v29 }
  0x39   :  { %2899 = vmatprep.mubr.msk.f32.mxu0 %vm93_vm0, %v49_v30 }
  0x3c   :  { %2900 = vmatmul.mubr.msk.f32.gmra.mrb[24].mxu0 %vm93_vm0, %v50_v31 }
  0x3d   :  { %2902 = vmatprep.mubr.msk.f32.mxu0 %vm93_vm0, %v51_v32 }
  0x40   :  { %2903 = vmatmul.mubr.msk.f32.gmra.mrb[26].mxu0 %vm93_vm0, %v52_v33 }
  0x41   :  { %2905 = vmatprep.mubr.msk.f32.mxu0 %vm93_vm0, %v53_v34 }
  0x44   :  { %2906 = vmatmul.mubr.msk.f32.gmra.mrb[28].mxu0 %vm93_vm0, %v54_v35 }
  0x45   :  { %2908 = vmatprep.mubr.msk.f32.mxu0 %vm93_vm0, %v55_v36 }
  0x48   :  { %2909 = vmatmul.mubr.msk.f32.gmra.mrb[30].mxu0 %vm93_vm0, %v56_v37 }
  0x49   :  { %2911 = vmatprep.mubr.msk.f32.mxu0 %vm93_vm0, %v57_v38 }
  0x4c   :  { %2912 = vmatmul.mubr.msk.f32.gmra.mrb[32].mxu0 %vm93_vm0, %v58_v39 }
  0x4d   :  { %2914 = vmatprep.mubr.msk.f32.mxu0 %vm93_vm0, %v59_v40 }
  0x50   :  { %2915 = vmatmul.mubr.msk.f32.gmra.mrb[34].mxu0 %vm93_vm0, %v60_v41 }
  0x51   :  { %2917 = vmatprep.mubr.msk.f32.mxu0 %vm93_vm0, %v61_v42 }
  0x54   :  { %2918 = vmatmul.mubr.msk.f32.gmra.mrb[36].mxu0 %vm93_vm0, %v62_v43 }
  0x55   :  { %2920 = vmatprep.mubr.msk.f32.mxu0 %vm93_vm0, %v63_v44 }
  0x58   :  { %2921 = vmatmul.mubr.msk.f32.gmra.mrb[38].mxu0 %vm93_vm0, %v64_v45 }
  0x59   :  { %2923 = vmatprep.mubr.msk.f32.mxu0 %vm93_vm0, %v65_v46 }
  0x5c   :  { %2924 = vmatmul.mubr.msk.f32.gmra.mrb[40].mxu0 %vm93_vm0, %v66_v47 }
  0x5d   :  { %2926 = vmatprep.mubr.msk.f32.mxu0 %vm93_vm0, %v67_v48 }
  0x60   :  { %2927 = vmatmul.mubr.msk.f32.gmra.mrb[42].mxu0 %vm93_vm0, %v68_v49 }
  0x61   :  { %2929 = vmatprep.mubr.msk.f32.mxu0 %vm93_vm0, %v69_v50 }
  0x64   :  { %2930 = vmatmul.mubr.msk.f32.gmra.mrb[44].mxu0 %vm93_vm0, %v70_v51 }
  0x65   :  { %2932 = vmatprep.mubr.msk.f32.mxu0 %vm93_vm0, %v71_v52 }
  0x68   :  { %2933 = vmatmul.mubr.msk.f32.gmra.mrb[46].mxu0 %vm93_vm0, %v72_v53 }
  0x69   :  { %2935 = vmatprep.mubr.msk.f32.mxu0 %vm93_vm0, %v73_v54 }
  0x6c   :  { %2936 = vmatmul.mubr.msk.f32.gmra.mrb[48].mxu0 %vm93_vm0, %v74_v55 }
  0x6d   :  { %2938 = vmatprep.mubr.msk.f32.mxu0 %vm93_vm0, %v75_v56 }
  0x70   :  { %2939 = vmatmul.mubr.msk.f32.gmra.mrb[50].mxu0 %vm93_vm0, %v76_v57 }
  0x71   :  { %2941 = vmatprep.mubr.msk.f32.mxu0 %vm93_vm0, %v77_v58 }
  0x74   :  { %2942 = vmatmul.mubr.msk.f32.gmra.mrb[52].mxu0 %vm93_vm0, %v78_v59 }
  0x75   :  { %2944 = vmatprep.mubr.msk.f32.mxu0 %vm93_vm0, %v79_v60 }
  0x78   :  { %2945 = vmatmul.mubr.msk.f32.gmra.mrb[54].mxu0 %vm93_vm0, %v80_v61 }
  0x79   :  { %2947 = vmatprep.mubr.msk.f32.mxu0 %vm93_vm0, %v81_v62 }
  0x7c   :  { %2948 = vmatmul.mubr.msk.f32.gmra.mrb[56].mxu0 %vm93_vm0, %v82_v63 }
  0x7d   :  { %2950 = vmatprep.mubr.msk.f32.mxu0 %vm93_vm0, %v83_v0 }
  0x80   :  { %2951 = vmatmul.mubr.msk.f32.gmra.mrb[58].mxu0 %vm93_vm0, %v84_v1 }
  0x81   :  { %2953 = vmatprep.mubr.msk.f32.mxu0 %vm93_vm0, %v85_v3 }
  0x84   :  { %2954 = vmatmul.mubr.msk.f32.gmra.mrb[60].mxu0 %vm93_vm0, %v86_v4 }
  0x85   :  { %2956 = vmatprep.mubr.msk.f32.mxu0 %vm93_vm0, %v87_v5 }
  0x88   :  { %2957 = vmatmul.mubr.msk.f32.gmra.mrb[62].mxu0 %vm93_vm0, %v88_v6 }
  0xdf   :  { %v3997_v7 = vpop.f32.mrb[0].mxu0 }
  0xe0   :  { %v2455_v8 = vmul.f32 -1.442695, %v3997_v7  ;;  %v4000_v9 = vpop.f32.mrb[1].mxu0 }
  0xe1   :  { %v2454_v10 = vmul.f32 -1.442695, %v4000_v9 }
  0xe2   :  { %3150 = vpow2.f32 %v2455_v8 }
  0xe3   :  { %3152 = vpow2.f32 %v2454_v10  ;;  %v4003_v11 = vpop.f32.mrb[2].mxu0 }
  0xe4   :  { %v2457_v12 = vmul.f32 -1.442695, %v4003_v11  ;;  %v4006_v13 = vpop.f32.mrb[3].mxu0 }
  0xe5   :  { %v2456_v14 = vmul.f32 -1.442695, %v4006_v13 }
  0xe6   :  { %3154 = vpow2.f32 %v2457_v12 }
  0xe7   :  { %3156 = vpow2.f32 %v2456_v14  ;;  %v4009_v15 = vpop.f32.mrb[4].mxu0 }
  0xe8   :  { %v2459_v16 = vmul.f32 -1.442695, %v4009_v15  ;;  %v4012_v17 = vpop.f32.mrb[5].mxu0 }
  0xe9   :  { %v2458_v18 = vmul.f32 -1.442695, %v4012_v17 }
  0xea   :  { %3158 = vpow2.f32 %v2459_v16 }
  0xeb   :  { %3160 = vpow2.f32 %v2458_v18  ;;  %v4015_v19 = vpop.f32.mrb[6].mxu0 }
  0xec   :  { %v3151_v20 = vpop.eup %3150  ;;  %v2461_v21 = vmul.f32 -1.442695, %v4015_v19  ;;  %v4018_v22 = vpop.f32.mrb[7].mxu0 }
  0xed   :  { %v3153_v23 = vpop.eup %3152  ;;  %v864_v24 = vadd.f32 1.0, %v3151_v20  ;;  %v2460_v25 = vmul.f32 -1.442695, %v4018_v22 }
  0xee   :  { %v863_v26 = vadd.f32 1.0, %v3153_v23  ;;  %3162 = vpow2.f32 %v2461_v21 }
  0xef   :  { %3164 = vrcp.f32 %v864_v24  ;;  %v4021_v27 = vpop.f32.mrb[8].mxu0 }
  0xf0   :  { %v3155_v28 = vpop.eup %3154  ;;  %3166 = vrcp.f32 %v863_v26  ;;  %v2463_v29 = vmul.f32 -1.442695, %v4021_v27  ;;  %v4024_v30 = vpop.f32.mrb[9].mxu0 }
  0xf1   :  { %v3157_v31 = vpop.eup %3156  ;;  %v866_v32 = vadd.f32 1.0, %v3155_v28  ;;  %3168 = vpow2.f32 %v2460_v25  ;;  %v2462_v33 = vmul.f32 -1.442695, %v4024_v30 }
  0xf2   :  { %v865_v34 = vadd.f32 1.0, %v3157_v31  ;;  %3170 = vpow2.f32 %v2463_v29 }
  0xf3   :  { %3172 = vrcp.f32 %v866_v32  ;;  %v4027_v35 = vpop.f32.mrb[10].mxu0 }
  0xf4   :  { %v3159_v36 = vpop.eup %3158  ;;  %3174 = vrcp.f32 %v865_v34  ;;  %v2465_v37 = vmul.f32 -1.442695, %v4027_v35  ;;  %v4030_v38 = vpop.f32.mrb[11].mxu0 }
  0xf5   :  { %v3161_v39 = vpop.eup %3160  ;;  %v868_v40 = vadd.f32 1.0, %v3159_v36  ;;  %3176 = vpow2.f32 %v2462_v33  ;;  %v2464_v41 = vmul.f32 -1.442695, %v4030_v38 }
  0xf6   :  { %v867_v42 = vadd.f32 1.0, %v3161_v39  ;;  %3178 = vpow2.f32 %v2465_v37 }
  0xf7   :  { %3180 = vrcp.f32 %v868_v40  ;;  %v4033_v43 = vpop.f32.mrb[12].mxu0 }
  0xf8   :  { %v3163_v44 = vpop.eup %3162  ;;  %3182 = vrcp.f32 %v867_v42  ;;  %v2467_v45 = vmul.f32 -1.442695, %v4033_v43  ;;  %v4036_v46 = vpop.f32.mrb[13].mxu0 }
  0xf9   :  { %v3165_v47 = vpop.eup %3164  ;;  %v870_v48 = vadd.f32 1.0, %v3163_v44  ;;  %3184 = vpow2.f32 %v2464_v41  ;;  %v2466_v49 = vmul.f32 -1.442695, %v4036_v46 }
  0xfa   :  { %v3167_v50 = vpop.eup %3166  ;;  %3186 = vpow2.f32 %v2467_v45  ;;  %v1056_v55 = vmul.f32 %v3165_v47, %v3997_v7 }
  0xfb   :  { %v3169_v51 = vpop.eup %3168  ;;  %v4039_v52 = vpop.f32.mrb[14].mxu0  ;;  %v1055_v53 = vmul.f32 %v3167_v50, %v4000_v9  ;;  %3188 = vpow2.f32 %v2466_v49 }
  0xfc   :  { %v3171_v54 = vpop.eup %3170  ;;  %v869_v56 = vadd.f32 1.0, %v3169_v51  ;;  %v2469_v57 = vmul.f32 -1.442695, %v4039_v52  ;;  %v4044_v58 = vpop.f32.mrb[15].mxu0  ;;  %3190 = vrcp.f32 %v870_v48 }
  0xfd   :  { %v3173_v59 = vpop.eup %3172  ;;  %v872_v60 = vadd.f32 1.0, %v3171_v54  ;;  %v2468_v61 = vmul.f32 -1.442695, %v4044_v58  ;;  %2961 = vmatprep.mubr.msk.f32.mxu1 %vm1124_vm1, %v1055_v53 }
  0xfe   :  { %v3175_v62 = vpop.eup %3174  ;;  %3192 = vrcp.f32 %v869_v56  ;;  %2962 = vmatmul.mubr.msk.f32.vlgmr.msra.gmra.mrb[0].mxu1 %vm1124_vm1, %v1056_v55  ;;  %v1058_v3 = vmul.f32 %v3173_v59, %v4003_v11 }
  0xff   :  { %v3177_v63 = vpop.eup %3176  ;;  %v1057_v0 = vmul.f32 %v3175_v62, %v4006_v13  ;;  %3194 = vrcp.f32 %v872_v60  ;;  %v4050_v1 = vpop.f32.mrb[16].mxu0 }
 0x100   :  { %v3179_v2 = vpop.eup %3178  ;;  %v871_v4 = vadd.f32 1.0, %v3177_v63  ;;  %3196 = vpow2.f32 %v2469_v57  ;;  %v2471_v5 = vmul.f32 -1.442695, %v4050_v1  ;;  %v4054_v6 = vpop.f32.mrb[17].mxu0 }
 0x101   :  { %v3181_v7 = vpop.eup %3180  ;;  %v874_v8 = vadd.f32 1.0, %v3179_v2  ;;  %3198 = vpow2.f32 %v2468_v61  ;;  %v2470_v9 = vmul.f32 -1.442695, %v4054_v6  ;;  %2964 = vmatprep.mubr.msk.f32.mxu1 %vm1124_vm1, %v1057_v0 }
 0x102   :  { %v3183_v10 = vpop.eup %3182  ;;  %3200 = vrcp.f32 %v871_v4  ;;  %2965 = vmatmul.mubr.msk.f32.gmra.mrb[2].mxu1 %vm1124_vm1, %v1058_v3  ;;  %v1060_v16 = vmul.f32 %v3181_v7, %v4009_v15 }
 0x103   :  { %v3185_v12 = vpop.eup %3184  ;;  %v1059_v11 = vmul.f32 %v3183_v10, %v4012_v17  ;;  %3202 = vrcp.f32 %v874_v8  ;;  %v4060_v13 = vpop.f32.mrb[18].mxu0 }
 0x104   :  { %v3187_v14 = vpop.eup %3186  ;;  %v873_v18 = vadd.f32 1.0, %v3185_v12  ;;  %3204 = vpow2.f32 %v2471_v5  ;;  %v2473_v20 = vmul.f32 -1.442695, %v4060_v13  ;;  %v4064_v21 = vpop.f32.mrb[19].mxu0 }
 0x105   :  { %v876_v23 = vadd.f32 1.0, %v3187_v14  ;;  %3206 = vpow2.f32 %v2470_v9  ;;  %2967 = vmatprep.mubr.msk.f32.mxu1 %vm1124_vm1, %v1059_v11  ;;  %v3189_v24 = vpop.eup %3188  ;;  %v2472_v17 = vmul.f32 -1.442695, %v4064_v21 }
 0x106   :  { %3208 = vrcp.f32 %v873_v18  ;;  %2968 = vmatmul.mubr.msk.f32.gmra.mrb[4].mxu1 %vm1124_vm1, %v1060_v16  ;;  %v3191_v25 = vpop.eup %3190  ;;  %v875_v26 = vadd.f32 1.0, %v3189_v24 }
 0x107   :  { %3210 = vrcp.f32 %v876_v23  ;;  %v4069_v15 = vpop.f32.mrb[20].mxu0  ;;  %v1062_v37 = vmul.f32 %v3191_v25, %v4015_v19 }
 0x108   :  { %v3193_v28 = vpop.eup %3192  ;;  %3212 = vpow2.f32 %v2473_v20  ;;  %v2475_v29 = vmul.f32 -1.442695, %v4069_v15  ;;  %v4072_v31 = vpop.f32.mrb[21].mxu0 }
 0x109   :  { %v3195_v32 = vpop.eup %3194  ;;  %v1061_v33 = vmul.f32 %v3193_v28, %v4018_v22  ;;  %3214 = vrcp.f32 %v875_v26  ;;  %v2474_v34 = vmul.f32 -1.442695, %v4072_v31 }
 0x10a   :  { %v3197_v36 = vpop.eup %3196  ;;  %3216 = vpow2.f32 %v2472_v17  ;;  %v1064_v50 = vmul.f32 %v3195_v32, %v4021_v27 }
 0x10b   :  { %v3199_v39 = vpop.eup %3198  ;;  %v878_v40 = vadd.f32 1.0, %v3197_v36  ;;  %3218 = vpow2.f32 %v2475_v29  ;;  %2970 = vmatprep.mubr.msk.f32.mxu1 %vm1124_vm1, %v1061_v33  ;;  %v4078_v41 = vpop.f32.mrb[22].mxu0 }
 0x10c   :  { %v3201_v42 = vpop.eup %3200  ;;  %v877_v44 = vadd.f32 1.0, %v3199_v39  ;;  %3220 = vpow2.f32 %v2474_v34  ;;  %2971 = vmatmul.mubr.msk.f32.gmra.mrb[6].mxu1 %vm1124_vm1, %v1062_v37  ;;  %v2477_v22 = vmul.f32 -1.442695, %v4078_v41  ;;  %v4082_v45 = vpop.f32.mrb[23].mxu0 }
 0x10d   :  { %v3203_v47 = vpop.eup %3202  ;;  %v1063_v19 = vmul.f32 %v3201_v42, %v4024_v30  ;;  %3222 = vrcp.f32 %v878_v40  ;;  %v2476_v48 = vmul.f32 -1.442695, %v4082_v45 }
 0x10e   :  { %v3205_v49 = vpop.eup %3204  ;;  %3224 = vrcp.f32 %v877_v44  ;;  %v1066_v62 = vmul.f32 %v3203_v47, %v4027_v35 }
 0x10f   :  { %v3207_v51 = vpop.eup %3206  ;;  %v880_v53 = vadd.f32 1.0, %v3205_v49  ;;  %3226 = vpow2.f32 %v2477_v22  ;;  %2973 = vmatprep.mubr.msk.f32.mxu1 %vm1124_vm1, %v1063_v19  ;;  %v4088_v54 = vpop.f32.mrb[24].mxu0 }
 0x110   :  { %v3209_v55 = vpop.eup %3208  ;;  %v879_v56 = vadd.f32 1.0, %v3207_v51  ;;  %3228 = vpow2.f32 %v2476_v48  ;;  %2974 = vmatmul.mubr.msk.f32.gmra.mrb[8].mxu1 %vm1124_vm1, %v1064_v50  ;;  %v2479_v30 = vmul.f32 -1.442695, %v4088_v54  ;;  %v4092_v57 = vpop.f32.mrb[25].mxu0 }
 0x111   :  { %v3211_v59 = vpop.eup %3210  ;;  %v1065_v27 = vmul.f32 %v3209_v55, %v4030_v38  ;;  %3230 = vrcp.f32 %v880_v53  ;;  %v2478_v60 = vmul.f32 -1.442695, %v4092_v57 }
 0x112   :  { %v3213_v61 = vpop.eup %3212  ;;  %3232 = vrcp.f32 %v879_v56  ;;  %v1068_v9 = vmul.f32 %v3211_v59, %v4033_v43 }
 0x113   :  { %v3215_v63 = vpop.eup %3214  ;;  %v882_v0 = vadd.f32 1.0, %v3213_v61  ;;  %3234 = vpow2.f32 %v2479_v30  ;;  %2976 = vmatprep.mubr.msk.f32.mxu1 %vm1124_vm1, %v1065_v27  ;;  %v4098_v2 = vpop.f32.mrb[26].mxu0 }
 0x114   :  { %v3217_v3 = vpop.eup %3216  ;;  %v1067_v4 = vmul.f32 %v3215_v63, %v4036_v46  ;;  %3236 = vpow2.f32 %v2478_v60  ;;  %2977 = vmatmul.mubr.msk.f32.gmra.mrb[10].mxu1 %vm1124_vm1, %v1066_v62  ;;  %v2481_v38 = vmul.f32 -1.442695, %v4098_v2  ;;  %v4103_v5 = vpop.f32.mrb[27].mxu0 }
 0x115   :  { %v3219_v7 = vpop.eup %3218  ;;  %3238 = vrcp.f32 %v882_v0  ;;  %v881_v35 = vadd.f32 1.0, %v3217_v3  ;;  %v2480_v12 = vmul.f32 -1.442695, %v4103_v5 }
 0x116   :  { %v3221_v8 = vpop.eup %3220  ;;  %v884_v10 = vadd.f32 1.0, %v3219_v7  ;;  %3240 = vpow2.f32 %v2481_v38  ;;  %2979 = vmatprep.mubr.msk.f32.mxu1 %vm1124_vm1, %v1067_v4 }
 0x117   :  { %v3223_v46 = vpop.eup %3222  ;;  %3242 = vrcp.f32 %v881_v35  ;;  %v883_v11 = vadd.f32 1.0, %v3221_v8  ;;  %v4108_v14 = vpop.f32.mrb[28].mxu0 }
 0x118   :  { %v3225_v16 = vpop.eup %3224  ;;  %3244 = vrcp.f32 %v884_v10  ;;  %2980 = vmatmul.mubr.msk.f32.gmra.mrb[12].mxu1 %vm1124_vm1, %v1068_v9  ;;  %v2483_v18 = vmul.f32 -1.442695, %v4108_v14  ;;  %v4112_v20 = vpop.f32.mrb[29].mxu0  ;;  %v1070_v17 = vmul.f32 %v3223_v46, %v4039_v52 }
 0x119   :  { %v3227_v43 = vpop.eup %3226  ;;  %v1069_v23 = vmul.f32 %v3225_v16, %v4044_v58  ;;  %3246 = vrcp.f32 %v883_v11  ;;  %v2482_v26 = vmul.f32 -1.442695, %v4112_v20 }
 0x11a   :  { %v3229_v24 = vpop.eup %3228  ;;  %v886_v25 = vadd.f32 1.0, %v3227_v43  ;;  %3248 = vpow2.f32 %v2480_v12 }
 0x11b   :  { %v3231_v28 = vpop.eup %3230  ;;  %v885_v29 = vadd.f32 1.0, %v3229_v24  ;;  %3250 = vpow2.f32 %v2483_v18  ;;  %2982 = vmatprep.mubr.msk.f32.mxu1 %vm1124_vm1, %v1069_v23  ;;  %v4118_v32 = vpop.f32.mrb[30].mxu0 }
 0x11c   :  { %v3233_v33 = vpop.eup %3232  ;;  %3252 = vrcp.f32 %v886_v25  ;;  %2983 = vmatmul.mubr.msk.f32.gmra.mrb[14].mxu1 %vm1124_vm1, %v1070_v17  ;;  %v2485_v58 = vmul.f32 -1.442695, %v4118_v32  ;;  %v4122_v34 = vpop.f32.mrb[31].mxu0  ;;  %v1072_v39 = vmul.f32 %v3231_v28, %v4050_v1 }
 0x11d   :  { %v3235_v52 = vpop.eup %3234  ;;  %v1071_v36 = vmul.f32 %v3233_v33, %v4054_v6  ;;  %3254 = vrcp.f32 %v885_v29  ;;  %v2484_v42 = vmul.f32 -1.442695, %v4122_v34 }
 0x11e   :  { %v3237_v37 = vpop.eup %3236  ;;  %v888_v40 = vadd.f32 1.0, %v3235_v52  ;;  %3256 = vpow2.f32 %v2482_v26 }
 0x11f   :  { %v3239_v44 = vpop.eup %3238  ;;  %v887_v22 = vadd.f32 1.0, %v3237_v37  ;;  %3258 = vpow2.f32 %v2485_v58  ;;  %2985 = vmatprep.mubr.msk.f32.mxu1 %vm1124_vm1, %v1071_v36  ;;  %v4128_v47 = vpop.f32.mrb[32].mxu0 }
 0x120   :  { %v3241_v19 = vpop.eup %3240  ;;  %3260 = vrcp.f32 %v888_v40  ;;  %2986 = vmatmul.mubr.msk.f32.gmra.mrb[16].mxu1 %vm1124_vm1, %v1072_v39  ;;  %v2487_v6 = vmul.f32 -1.442695, %v4128_v47  ;;  %v4132_v48 = vpop.f32.mrb[33].mxu0  ;;  %v1074_v56 = vmul.f32 %v3239_v44, %v4060_v13 }
 0x121   :  { %v3243_v1 = vpop.eup %3242  ;;  %3262 = vrcp.f32 %v887_v22  ;;  %v890_v49 = vadd.f32 1.0, %v3241_v19  ;;  %v2486_v50 = vmul.f32 -1.442695, %v4132_v48 }
 0x122   :  { %v3245_v51 = vpop.eup %3244  ;;  %v1073_v53 = vmul.f32 %v3243_v1, %v4064_v21  ;;  %3264 = vpow2.f32 %v2484_v42 }
 0x123   :  { %v3247_v55 = vpop.eup %3246  ;;  %3266 = vrcp.f32 %v890_v49  ;;  %v4137_v30 = vpop.f32.mrb[34].mxu0  ;;  %v1076_v3 = vmul.f32 %v3245_v51, %v4069_v15 }
 0x124   :  { %v3249_v59 = vpop.eup %3248  ;;  %v1075_v27 = vmul.f32 %v3247_v55, %v4072_v31  ;;  %3268 = vpow2.f32 %v2487_v6  ;;  %2988 = vmatprep.mubr.msk.f32.mxu1 %vm1124_vm1, %v1073_v53  ;;  %v2489_v60 = vmul.f32 -1.442695, %v4137_v30  ;;  %v4142_v61 = vpop.f32.mrb[35].mxu0 }
 0x125   :  { %v3251_v62 = vpop.eup %3250  ;;  %v889_v63 = vadd.f32 1.0, %v3249_v59  ;;  %3270 = vpow2.f32 %v2486_v50  ;;  %2989 = vmatmul.mubr.msk.f32.gmra.mrb[18].mxu1 %vm1124_vm1, %v1074_v56  ;;  %v2488_v13 = vmul.f32 -1.442695, %v4142_v61 }
 0x126   :  { %v3253_v21 = vpop.eup %3252  ;;  %v892_v0 = vadd.f32 1.0, %v3251_v62  ;;  %3272 = vpow2.f32 %v2489_v60  ;;  %2991 = vmatprep.mubr.msk.f32.mxu1 %vm1124_vm1, %v1075_v27 }
 0x127   :  { %v3255_v31 = vpop.eup %3254  ;;  %3274 = vrcp.f32 %v889_v63  ;;  %v4148_v4 = vpop.f32.mrb[36].mxu0 }
 0x128   :  { %v3257_v38 = vpop.eup %3256  ;;  %v1077_v7 = vmul.f32 %v3255_v31, %v4082_v45  ;;  %3276 = vrcp.f32 %v892_v0  ;;  %v2491_v35 = vmul.f32 -1.442695, %v4148_v4  ;;  %v4152_v8 = vpop.f32.mrb[37].mxu0  ;;  %v1078_v45 = vmul.f32 %v3253_v21, %v4078_v41 }
 0x129   :  { %v3259_v9 = vpop.eup %3258  ;;  %v891_v10 = vadd.f32 1.0, %v3257_v38  ;;  %3278 = vpow2.f32 %v2488_v13  ;;  %2992 = vmatmul.mubr.msk.f32.gmra.mrb[20].mxu1 %vm1124_vm1, %v1076_v3  ;;  %v2490_v12 = vmul.f32 -1.442695, %v4152_v8 }
 0x12a   :  { %v3261_v46 = vpop.eup %3260  ;;  %v894_v15 = vadd.f32 1.0, %v3259_v9  ;;  %3280 = vpow2.f32 %v2491_v35  ;;  %2994 = vmatprep.mubr.msk.f32.mxu1 %vm1124_vm1, %v1077_v7 }
 0x12b   :  { %v3263_v11 = vpop.eup %3262  ;;  %3282 = vrcp.f32 %v891_v10  ;;  %v4158_v16 = vpop.f32.mrb[38].mxu0  ;;  %v1080_v29 = vmul.f32 %v3261_v46, %v4088_v54 }
 0x12c   :  { %v3265_v18 = vpop.eup %3264  ;;  %v1079_v43 = vmul.f32 %v3263_v11, %v4092_v57  ;;  %3284 = vrcp.f32 %v894_v15  ;;  %v2493_v23 = vmul.f32 -1.442695, %v4158_v16  ;;  %v4162_v24 = vpop.f32.mrb[39].mxu0 }
 0x12d   :  { %v3267_v17 = vpop.eup %3266  ;;  %v893_v25 = vadd.f32 1.0, %v3265_v18  ;;  %3286 = vpow2.f32 %v2490_v12  ;;  %2995 = vmatmul.mubr.msk.f32.gmra.mrb[22].mxu1 %vm1124_vm1, %v1078_v45  ;;  %v2492_v26 = vmul.f32 -1.442695, %v4162_v24 }
 0x12e   :  { %v3269_v28 = vpop.eup %3268  ;;  %3288 = vpow2.f32 %v2493_v23  ;;  %2997 = vmatprep.mubr.msk.f32.mxu1 %vm1124_vm1, %v1079_v43  ;;  %v1082_v19 = vmul.f32 %v3267_v17, %v4098_v2 }
 0x12f   :  { %v3271_v41 = vpop.eup %3270  ;;  %3290 = vrcp.f32 %v893_v25  ;;  %v896_v57 = vadd.f32 1.0, %v3269_v28  ;;  %v4168_v33 = vpop.f32.mrb[40].mxu0 }
 0x130   :  { %v3273_v58 = vpop.eup %3272  ;;  %v895_v52 = vadd.f32 1.0, %v3271_v41  ;;  %3292 = vpow2.f32 %v2492_v26  ;;  %v2495_v36 = vmul.f32 -1.442695, %v4168_v33  ;;  %v4171_v37 = vpop.f32.mrb[41].mxu0 }
 0x131   :  { %v3275_v39 = vpop.eup %3274  ;;  %3294 = vrcp.f32 %v896_v57  ;;  %v898_v40 = vadd.f32 1.0, %v3273_v58  ;;  %2998 = vmatmul.mubr.msk.f32.gmra.mrb[24].mxu1 %vm1124_vm1, %v1080_v29  ;;  %v2494_v42 = vmul.f32 -1.442695, %v4171_v37 }
 0x132   :  { %v3277_v44 = vpop.eup %3276  ;;  %v1081_v54 = vmul.f32 %v3275_v39, %v4103_v5  ;;  %3296 = vrcp.f32 %v895_v52 }
 0x133   :  { %v3279_v22 = vpop.eup %3278  ;;  %3298 = vrcp.f32 %v898_v40  ;;  %v4177_v6 = vpop.f32.mrb[42].mxu0  ;;  %v1084_v27 = vmul.f32 %v3277_v44, %v4108_v14 }
 0x134   :  { %v3281_v1 = vpop.eup %3280  ;;  %v897_v49 = vadd.f32 1.0, %v3279_v22  ;;  %3300 = vpow2.f32 %v2495_v36  ;;  %3000 = vmatprep.mubr.msk.f32.mxu1 %vm1124_vm1, %v1081_v54  ;;  %v2497_v50 = vmul.f32 -1.442695, %v4177_v6  ;;  %v4181_v51 = vpop.f32.mrb[43].mxu0 }
 0x135   :  { %v3283_v53 = vpop.eup %3282  ;;  %v900_v55 = vadd.f32 1.0, %v3281_v1  ;;  %3302 = vpow2.f32 %v2494_v42  ;;  %3001 = vmatmul.mubr.msk.f32.gmra.mrb[26].mxu1 %vm1124_vm1, %v1082_v19  ;;  %v2496_v5 = vmul.f32 -1.442695, %v4181_v51 }
 0x136   :  { %v3285_v2 = vpop.eup %3284  ;;  %v1083_v56 = vmul.f32 %v3283_v53, %v4112_v20  ;;  %3304 = vrcp.f32 %v897_v49 }
 0x137   :  { %v3287_v59 = vpop.eup %3286  ;;  %3306 = vrcp.f32 %v900_v55  ;;  %v4187_v60 = vpop.f32.mrb[44].mxu0  ;;  %v1086_v7 = vmul.f32 %v3285_v2, %v4118_v32 }
 0x138   :  { %v3289_v62 = vpop.eup %3288  ;;  %v899_v63 = vadd.f32 1.0, %v3287_v59  ;;  %3308 = vpow2.f32 %v2497_v50  ;;  %3003 = vmatprep.mubr.msk.f32.mxu1 %vm1124_vm1, %v1083_v56  ;;  %v2499_v13 = vmul.f32 -1.442695, %v4187_v60  ;;  %v4191_v21 = vpop.f32.mrb[45].mxu0 }
 0x139   :  { %v3291_v0 = vpop.eup %3290  ;;  %v902_v31 = vadd.f32 1.0, %v3289_v62  ;;  %3310 = vpow2.f32 %v2496_v5  ;;  %3004 = vmatmul.mubr.msk.f32.gmra.mrb[28].mxu1 %vm1124_vm1, %v1084_v27  ;;  %v2498_v3 = vmul.f32 -1.442695, %v4191_v21 }
 0x13a   :  { %v3293_v20 = vpop.eup %3292  ;;  %v1085_v14 = vmul.f32 %v3291_v0, %v4122_v34  ;;  %3312 = vrcp.f32 %v899_v63 }
 0x13b   :  { %v3295_v38 = vpop.eup %3294  ;;  %3314 = vrcp.f32 %v902_v31  ;;  %v901_v35 = vadd.f32 1.0, %v3293_v20  ;;  %v4197_v9 = vpop.f32.mrb[46].mxu0 }
 0x13c   :  { %v3297_v10 = vpop.eup %3296  ;;  %3316 = vpow2.f32 %v2499_v13  ;;  %3006 = vmatprep.mubr.msk.f32.mxu1 %vm1124_vm1, %v1085_v14  ;;  %v2501_v12 = vmul.f32 -1.442695, %v4197_v9  ;;  %v4201_v46 = vpop.f32.mrb[47].mxu0  ;;  %v1088_v18 = vmul.f32 %v3295_v38, %v4128_v47 }
 0x13d   :  { %v3299_v15 = vpop.eup %3298  ;;  %v1087_v34 = vmul.f32 %v3297_v10, %v4132_v48  ;;  %3318 = vrcp.f32 %v901_v35  ;;  %3007 = vmatmul.mubr.msk.f32.gmra.mrb[30].mxu1 %vm1124_vm1, %v1086_v7  ;;  %v2500_v32 = vmul.f32 -1.442695, %v4201_v46 }
 0x13e   :  { %v3301_v11 = vpop.eup %3300  ;;  %3320 = vpow2.f32 %v2498_v3  ;;  %v1090_v58 = vmul.f32 %v3299_v15, %v4137_v30 }
 0x13f   :  { %v3303_v45 = vpop.eup %3302  ;;  %v904_v43 = vadd.f32 1.0, %v3301_v11  ;;  %3322 = vpow2.f32 %v2501_v12  ;;  %3009 = vmatprep.mubr.msk.f32.mxu1 %vm1124_vm1, %v1087_v34  ;;  %v4208_v23 = vpop.f32.mrb[48].mxu0 }
 0x140   :  { %v3305_v17 = vpop.eup %3304  ;;  %v903_v25 = vadd.f32 1.0, %v3303_v45  ;;  %3324 = vpow2.f32 %v2500_v32  ;;  %v2503_v48 = vmul.f32 -1.442695, %v4208_v23  ;;  %v4211_v26 = vpop.f32.mrb[49].mxu0 }
 0x141   :  { %v3307_v28 = vpop.eup %3306  ;;  %v1089_v41 = vmul.f32 %v3305_v17, %v4142_v61  ;;  %3326 = vrcp.f32 %v904_v43  ;;  %3010 = vmatmul.mubr.msk.f32.gmra.mrb[32].mxu1 %vm1124_vm1, %v1088_v18  ;;  %v2502_v47 = vmul.f32 -1.442695, %v4211_v26 }
 0x142   :  { %v3309_v29 = vpop.eup %3308  ;;  %3328 = vrcp.f32 %v903_v25  ;;  %v1092_v1 = vmul.f32 %v3307_v28, %v4148_v4 }
 0x143   :  { %v3311_v57 = vpop.eup %3310  ;;  %v906_v52 = vadd.f32 1.0, %v3309_v29  ;;  %3330 = vpow2.f32 %v2503_v48  ;;  %3012 = vmatprep.mubr.msk.f32.mxu1 %vm1124_vm1, %v1089_v41  ;;  %v4218_v36 = vpop.f32.mrb[50].mxu0 }
 0x144   :  { %v3313_v39 = vpop.eup %3312  ;;  %v905_v40 = vadd.f32 1.0, %v3311_v57  ;;  %3332 = vpow2.f32 %v2502_v47  ;;  %v2505_v61 = vmul.f32 -1.442695, %v4218_v36  ;;  %v4221_v42 = vpop.f32.mrb[51].mxu0 }
 0x145   :  { %v3315_v44 = vpop.eup %3314  ;;  %v1091_v54 = vmul.f32 %v3313_v39, %v4152_v8  ;;  %3334 = vrcp.f32 %v906_v52  ;;  %3013 = vmatmul.mubr.msk.f32.gmra.mrb[34].mxu1 %vm1124_vm1, %v1090_v58  ;;  %v2504_v30 = vmul.f32 -1.442695, %v4221_v42 }
 0x146   :  { %v3317_v22 = vpop.eup %3316  ;;  %3336 = vrcp.f32 %v905_v40 }
 0x147   :  { %v3319_v19 = vpop.eup %3318  ;;  %v908_v49 = vadd.f32 1.0, %v3317_v22  ;;  %3338 = vpow2.f32 %v2505_v61  ;;  %3015 = vmatprep.mubr.msk.f32.mxu1 %vm1124_vm1, %v1091_v54  ;;  %v4228_v50 = vpop.f32.mrb[52].mxu0 }
 0x148   :  { %v3321_v53 = vpop.eup %3320  ;;  %v1093_v55 = vmul.f32 %v3319_v19, %v4162_v24  ;;  %3340 = vpow2.f32 %v2504_v30  ;;  %v2507_v8 = vmul.f32 -1.442695, %v4228_v50  ;;  %v4232_v5 = vpop.f32.mrb[53].mxu0  ;;  %v1094_v24 = vmul.f32 %v3315_v44, %v4158_v16 }
 0x149   :  { %v3323_v2 = vpop.eup %3322  ;;  %3342 = vrcp.f32 %v908_v49  ;;  %v907_v56 = vadd.f32 1.0, %v3321_v53  ;;  %3016 = vmatmul.mubr.msk.f32.gmra.mrb[36].mxu1 %vm1124_vm1, %v1092_v1  ;;  %v2506_v27 = vmul.f32 -1.442695, %v4232_v5 }
 0x14a   :  { %v3325_v4 = vpop.eup %3324  ;;  %v910_v59 = vadd.f32 1.0, %v3323_v2  ;;  %3344 = vpow2.f32 %v2507_v8  ;;  %3018 = vmatprep.mubr.msk.f32.mxu1 %vm1124_vm1, %v1093_v55 }
 0x14b   :  { %v3327_v62 = vpop.eup %3326  ;;  %3346 = vrcp.f32 %v907_v56  ;;  %v909_v63 = vadd.f32 1.0, %v3325_v4  ;;  %v4238_v13 = vpop.f32.mrb[54].mxu0 }
 0x14c   :  { %v3329_v0 = vpop.eup %3328  ;;  %3348 = vrcp.f32 %v910_v59  ;;  %v2509_v31 = vmul.f32 -1.442695, %v4238_v13  ;;  %v4241_v20 = vpop.f32.mrb[55].mxu0  ;;  %v1096_v10 = vmul.f32 %v3327_v62, %v4168_v33 }
 0x14d   :  { %v3331_v14 = vpop.eup %3330  ;;  %v1095_v3 = vmul.f32 %v3329_v0, %v4171_v37  ;;  %3350 = vrcp.f32 %v909_v63  ;;  %3019 = vmatmul.mubr.msk.f32.gmra.mrb[38].mxu1 %vm1124_vm1, %v1094_v24  ;;  %v2508_v16 = vmul.f32 -1.442695, %v4241_v20 }
 0x14e   :  { %v3333_v38 = vpop.eup %3332  ;;  %v912_v7 = vadd.f32 1.0, %v3331_v14  ;;  %3352 = vpow2.f32 %v2506_v27 }
 0x14f   :  { %v3335_v35 = vpop.eup %3334  ;;  %v911_v12 = vadd.f32 1.0, %v3333_v38  ;;  %3354 = vpow2.f32 %v2509_v31  ;;  %3021 = vmatprep.mubr.msk.f32.mxu1 %vm1124_vm1, %v1095_v3  ;;  %v4248_v15 = vpop.f32.mrb[56].mxu0 }
 0x150   :  { %v3337_v34 = vpop.eup %3336  ;;  %3356 = vrcp.f32 %v912_v7  ;;  %v2511_v37 = vmul.f32 -1.442695, %v4248_v15  ;;  %v4251_v32 = vpop.f32.mrb[57].mxu0  ;;  %v1098_v25 = vmul.f32 %v3335_v35, %v4177_v6 }
 0x151   :  { %v3339_v11 = vpop.eup %3338  ;;  %v1097_v45 = vmul.f32 %v3337_v34, %v4181_v51  ;;  %3358 = vrcp.f32 %v911_v12  ;;  %3022 = vmatmul.mubr.msk.f32.gmra.mrb[40].mxu1 %vm1124_vm1, %v1096_v10  ;;  %v2510_v43 = vmul.f32 -1.442695, %v4251_v32 }
 0x152   :  { %v3341_v18 = vpop.eup %3340  ;;  %v914_v33 = vadd.f32 1.0, %v3339_v11  ;;  %3360 = vpow2.f32 %v2508_v16 }
 0x153   :  { %v3343_v17 = vpop.eup %3342  ;;  %v913_v48 = vadd.f32 1.0, %v3341_v18  ;;  %3362 = vpow2.f32 %v2511_v37  ;;  %3024 = vmatprep.mubr.msk.f32.mxu1 %vm1124_vm1, %v1097_v45  ;;  %v4258_v28 = vpop.f32.mrb[58].mxu0 }
 0x154   :  { %v3345_v41 = vpop.eup %3344  ;;  %3364 = vrcp.f32 %v914_v33  ;;  %v2513_v51 = vmul.f32 -1.442695, %v4258_v28  ;;  %v4261_v47 = vpop.f32.mrb[59].mxu0  ;;  %v1100_v40 = vmul.f32 %v3343_v17, %v4187_v60 }
 0x155   :  { %v3347_v29 = vpop.eup %3346  ;;  %3366 = vrcp.f32 %v913_v48  ;;  %v916_v57 = vadd.f32 1.0, %v3345_v41  ;;  %3025 = vmatmul.mubr.msk.f32.gmra.mrb[42].mxu1 %vm1124_vm1, %v1098_v25  ;;  %v2512_v58 = vmul.f32 -1.442695, %v4261_v47 }
 0x156   :  { %v3349_v6 = vpop.eup %3348  ;;  %v1099_v52 = vmul.f32 %v3347_v29, %v4191_v21  ;;  %3368 = vpow2.f32 %v2510_v43 }
 0x157   :  { %v3351_v39 = vpop.eup %3350  ;;  %3370 = vrcp.f32 %v916_v57  ;;  %v4267_v61 = vpop.f32.mrb[60].mxu0  ;;  %v1102_v53 = vmul.f32 %v3349_v6, %v4197_v9 }
 0x158   :  { %v3353_v44 = vpop.eup %3352  ;;  %v1101_v54 = vmul.f32 %v3351_v39, %v4201_v46  ;;  %3372 = vpow2.f32 %v2513_v51  ;;  %3027 = vmatprep.mubr.msk.f32.mxu1 %vm1124_vm1, %v1099_v52  ;;  %v2515_v30 = vmul.f32 -1.442695, %v4267_v61  ;;  %v4272_v22 = vpop.f32.mrb[61].mxu0 }
 0x159   :  { %v3355_v19 = vpop.eup %3354  ;;  %v915_v1 = vadd.f32 1.0, %v3353_v44  ;;  %3374 = vpow2.f32 %v2512_v58  ;;  %3028 = vmatmul.mubr.msk.f32.gmra.mrb[44].mxu1 %vm1124_vm1, %v1100_v40  ;;  %v2514_v60 = vmul.f32 -1.442695, %v4272_v22 }
 0x15a   :  { %v3357_v21 = vpop.eup %3356  ;;  %v918_v49 = vadd.f32 1.0, %v3355_v19  ;;  %3376 = vpow2.f32 %v2515_v30  ;;  %3030 = vmatprep.mubr.msk.f32.mxu1 %vm1124_vm1, %v1101_v54 }
 0x15b   :  { %v3359_v46 = vpop.eup %3358  ;;  %3378 = vrcp.f32 %v915_v1  ;;  %v4278_v55 = vpop.f32.mrb[62].mxu0 }
 0x15c   :  { %v3361_v8 = vpop.eup %3360  ;;  %v1103_v2 = vmul.f32 %v3359_v46, %v4211_v26  ;;  %3380 = vrcp.f32 %v918_v49  ;;  %v2517_v56 = vmul.f32 -1.442695, %v4278_v55  ;;  %v4282_v4 = vpop.f32.mrb[63].mxu0  ;;  %v1104_v26 = vmul.f32 %v3357_v21, %v4208_v23 }
 0x15d   :  { %v3363_v59 = vpop.eup %3362  ;;  %v917_v27 = vadd.f32 1.0, %v3361_v8  ;;  %3382 = vpow2.f32 %v2514_v60  ;;  %3031 = vmatmul.mubr.msk.f32.gmra.mrb[46].mxu1 %vm1124_vm1, %v1102_v53  ;;  %v2516_v62 = vmul.f32 -1.442695, %v4282_v4 }
 0x15e   :  { %v3365_v24 = vpop.eup %3364  ;;  %v920_v9 = vadd.f32 1.0, %v3363_v59  ;;  %3384 = vpow2.f32 %v2517_v56  ;;  %3033 = vmatprep.mubr.msk.f32.mxu1 %vm1124_vm1, %v1103_v2 }
 0x15f   :  { %v3367_v63 = vpop.eup %3366  ;;  %3386 = vrcp.f32 %v917_v27  ;;  %v1106_v16 = vmul.f32 %v3365_v24, %v4218_v36 }
 0x160   :  { %v3369_v0 = vpop.eup %3368  ;;  %v1105_v31 = vmul.f32 %v3367_v63, %v4221_v42  ;;  %3388 = vpow2.f32 %v2516_v62 }
 0x161   :  { %v3371_v14 = vpop.eup %3370  ;;  %v919_v3 = vadd.f32 1.0, %v3369_v0  ;;  %3034 = vmatmul.mubr.msk.f32.gmra.mrb[48].mxu1 %vm1124_vm1, %v1104_v26  ;;  %3390 = vrcp.f32 %v920_v9 }
 0x162   :  { %v3373_v38 = vpop.eup %3372  ;;  %3036 = vmatprep.mubr.msk.f32.mxu1 %vm1124_vm1, %v1105_v31  ;;  %v1108_v45 = vmul.f32 %v3371_v14, %v4228_v50 }
 0x163   :  { %v3375_v7 = vpop.eup %3374  ;;  %3392 = vrcp.f32 %v919_v3  ;;  %v922_v35 = vadd.f32 1.0, %v3373_v38 }
 0x164   :  { %v3377_v10 = vpop.eup %3376  ;;  %v921_v23 = vadd.f32 1.0, %v3375_v7 }
 0x165   :  { %v3379_v12 = vpop.eup %3378  ;;  %3394 = vrcp.f32 %v922_v35  ;;  %v924_v34 = vadd.f32 1.0, %v3377_v10  ;;  %3037 = vmatmul.mubr.msk.f32.gmra.mrb[50].mxu1 %vm1124_vm1, %v1106_v16 }
 0x166   :  { %v3381_v42 = vpop.eup %3380  ;;  %v1107_v37 = vmul.f32 %v3379_v12, %v4232_v5  ;;  %3396 = vrcp.f32 %v921_v23 }
 0x167   :  { %v3383_v11 = vpop.eup %3382  ;;  %3398 = vrcp.f32 %v924_v34  ;;  %v1110_v48 = vmul.f32 %v3381_v42, %v4238_v13 }
 0x168   :  { %v3385_v18 = vpop.eup %3384  ;;  %v923_v33 = vadd.f32 1.0, %v3383_v11  ;;  %3039 = vmatprep.mubr.msk.f32.mxu1 %vm1124_vm1, %v1107_v37 }
 0x169   :  { %v3387_v36 = vpop.eup %3386  ;;  %v926_v43 = vadd.f32 1.0, %v3385_v18  ;;  %3040 = vmatmul.mubr.msk.f32.gmra.mrb[52].mxu1 %vm1124_vm1, %v1108_v45 }
 0x16a   :  { %v1109_v17 = vmul.f32 %v3387_v36, %v4241_v20  ;;  %3400 = vrcp.f32 %v923_v33  ;;  %v3389_v25 = vpop.eup %3388 }
 0x16b   :  { %v3391_v5 = vpop.eup %3390  ;;  %v925_v41 = vadd.f32 1.0, %v3389_v25  ;;  %3402 = vrcp.f32 %v926_v43 }
 0x16c   :  { %3042 = vmatprep.mubr.msk.f32.mxu1 %vm1124_vm1, %v1109_v17  ;;  %v1112_v57 = vmul.f32 %v3391_v5, %v4248_v15 }
 0x16d   :  { %v3393_v50 = vpop.eup %3392  ;;  %3043 = vmatmul.mubr.msk.f32.gmra.mrb[54].mxu1 %vm1124_vm1, %v1110_v48  ;;  %3404 = vrcp.f32 %v925_v41 }
 0x16e   :  { %v1111_v51 = vmul.f32 %v3393_v50, %v4251_v32 }
 0x16f   :  { %v3395_v29 = vpop.eup %3394 }
 0x170   :  { %v3397_v58 = vpop.eup %3396  ;;  %3045 = vmatprep.mubr.msk.f32.mxu1 %vm1124_vm1, %v1111_v51  ;;  %v1114_v6 = vmul.f32 %v3395_v29, %v4258_v28  ;;  %v1120_v28 = vlaneseq }
 0x171   :  { %v1113_v20 = vmul.f32 %v3397_v58, %v4261_v47  ;;  %3046 = vmatmul.mubr.msk.f32.gmra.mrb[56].mxu1 %vm1124_vm1, %v1112_v57  ;;  %v3399_v13 = vpop.eup %3398 }
 0x172   :  { %v1116_v15 = vmul.f32 %v3399_v13, %v4267_v61  ;;  %v4317_v54 = vshrl.u32 %v1120_v28, 7  ;;  %v24_v61 = vld [vmem:[%s4833_s3] sm:$0x3] }
 0x173   :  { %3048 = vmatprep.mubr.msk.f32.mxu1 %vm1124_vm1, %v1113_v20 }
 0x174   :  { %v3401_v52 = vpop.eup %3400  ;;  %v1122_v30 = vsub.s32 0, %v4317_v54 }
 0x175   :  { %v1115_v39 = vmul.f32 %v3401_v52, %v4272_v22  ;;  %3049 = vmatmul.mubr.msk.f32.gmra.mrb[58].mxu1 %vm1124_vm1, %v1114_v6  ;;  %v3403_v32 = vpop.eup %3402 }
 0x176   :  { %v1118_v44 = vmul.f32 %v3403_v32, %v4278_v55  ;;  %v4323_v22 = vrot.slane %v24_v61, %v1122_v30 }
 0x177   :  { %3051 = vmatprep.mubr.msk.f32.mxu1 %vm1124_vm1, %v1115_v39  ;;  %v3405_v40 = vpop.eup %3404 }
 0x178   :  { %v1117_v47 = vmul.f32 %v3405_v40, %v4282_v4 }
 0x179   :  { %3052 = vmatmul.mubr.msk.f32.gmra.mrb[60].mxu1 %vm1124_vm1, %v1116_v15 }
 0x17a   :  { %3054 = vmatprep.mubr.msk.f32.mxu1 %vm1124_vm1, %v1117_v47 }
 0x17d   :  { %3055 = vmatmul.mubr.msk.f32.gmra.mrb[62].mxu1 %vm1124_vm1, %v1118_v44 }
 0x1d1   :  { %v2963_v19 = vpop.f32.mrb[0].mxu1 }
 0x1d2   :  { %v4326_v1 = vadd.f32 %v2963_v19, %v4323_v22  ;;  %v1383_v60 = vpop.f32.mrb[1].mxu1 }
 0x1d3   :  { %v4329_v21 = vadd.f32 %v1383_v60, %v4323_v22 }
 0x1d4   :  { %v2583_v49 = vmul.f32 -1.442695, %v4326_v1 }
 0x1d5   :  { %v2582_v46 = vmul.f32 -1.442695, %v4329_v21  ;;  %v2966_v53 = vpop.f32.mrb[2].mxu1 }
 0x1d6   :  { %3406 = vpow2.f32 %v2583_v49  ;;  %v4334_v55 = vadd.f32 %v2966_v53, %v4323_v22  ;;  %v1393_v8 = vpop.f32.mrb[3].mxu1 }
 0x1d7   :  { %3408 = vpow2.f32 %v2582_v46  ;;  %v4337_v2 = vadd.f32 %v1393_v8, %v4323_v22 }
 0x1d8   :  { %v2585_v56 = vmul.f32 -1.442695, %v4334_v55 }
 0x1d9   :  { %v2584_v4 = vmul.f32 -1.442695, %v4337_v2  ;;  %v2969_v59 = vpop.f32.mrb[4].mxu1 }
 0x1da   :  { %3410 = vpow2.f32 %v2585_v56  ;;  %v4342_v27 = vadd.f32 %v2969_v59, %v4323_v22  ;;  %v1403_v62 = vpop.f32.mrb[5].mxu1 }
 0x1db   :  { %3412 = vpow2.f32 %v2584_v4  ;;  %v4345_v24 = vadd.f32 %v1403_v62, %v4323_v22 }
 0x1dc   :  { %v2587_v9 = vmul.f32 -1.442695, %v4342_v27 }
 0x1dd   :  { %v2586_v63 = vmul.f32 -1.442695, %v4345_v24 }
 0x1de   :  { %3414 = vpow2.f32 %v2587_v9 }
 0x1df   :  { %3416 = vpow2.f32 %v2586_v63  ;;  %v2972_v26 = vpop.f32.mrb[6].mxu1 }
 0x1e0   :  { %v3407_v0 = vpop.eup %3406  ;;  %v4350_v31 = vadd.f32 %v2972_v26, %v4323_v22  ;;  %v1413_v14 = vpop.f32.mrb[7].mxu1 }
 0x1e1   :  { %v3409_v3 = vpop.eup %3408  ;;  %v1895_v38 = vadd.f32 1.0, %v3407_v0  ;;  %v4353_v7 = vadd.f32 %v1413_v14, %v4323_v22 }
 0x1e2   :  { %v1894_v16 = vadd.f32 1.0, %v3409_v3  ;;  %v2589_v35 = vmul.f32 -1.442695, %v4350_v31 }
 0x1e3   :  { %3418 = vrcp.f32 %v1895_v38  ;;  %v2588_v10 = vmul.f32 -1.442695, %v4353_v7  ;;  %v2975_v23 = vpop.f32.mrb[8].mxu1 }
 0x1e4   :  { %v3411_v12 = vpop.eup %3410  ;;  %3420 = vrcp.f32 %v1894_v16  ;;  %v4358_v34 = vadd.f32 %v2975_v23, %v4323_v22  ;;  %v1423_v42 = vpop.f32.mrb[9].mxu1 }
 0x1e5   :  { %v3413_v37 = vpop.eup %3412  ;;  %v1897_v11 = vadd.f32 1.0, %v3411_v12  ;;  %3422 = vpow2.f32 %v2589_v35  ;;  %v4361_v45 = vadd.f32 %v1423_v42, %v4323_v22 }
 0x1e6   :  { %v1896_v18 = vadd.f32 1.0, %v3413_v37  ;;  %3424 = vpow2.f32 %v2588_v10  ;;  %v2591_v33 = vmul.f32 -1.442695, %v4358_v34 }
 0x1e7   :  { %3426 = vrcp.f32 %v1897_v11  ;;  %v2590_v36 = vmul.f32 -1.442695, %v4361_v45  ;;  %v2978_v43 = vpop.f32.mrb[10].mxu1 }
 0x1e8   :  { %v3415_v17 = vpop.eup %3414  ;;  %3428 = vrcp.f32 %v1896_v18  ;;  %v4366_v25 = vadd.f32 %v2978_v43, %v4323_v22  ;;  %v1433_v48 = vpop.f32.mrb[11].mxu1 }
 0x1e9   :  { %v3417_v5 = vpop.eup %3416  ;;  %v1899_v41 = vadd.f32 1.0, %v3415_v17  ;;  %3430 = vpow2.f32 %v2591_v33  ;;  %v4369_v50 = vadd.f32 %v1433_v48, %v4323_v22  ;;  %v2151_v33 = vld [vmem:[%s4834_s4 + $0x8] sm:$0xff] }
 0x1ea   :  { %v1898_v51 = vadd.f32 1.0, %v3417_v5  ;;  %3432 = vpow2.f32 %v2590_v36  ;;  %v2593_v29 = vmul.f32 -1.442695, %v4366_v25  ;;  %2218 = vmatprep.mubr.f32.mxu1 %v2151_v33 }
 0x1eb   :  { %3434 = vrcp.f32 %v1899_v41  ;;  %v2592_v57 = vmul.f32 -1.442695, %v4369_v50  ;;  %v2981_v58 = vpop.f32.mrb[12].mxu1 }
 0x1ec   :  { %3436 = vrcp.f32 %v1898_v51  ;;  %v4374_v20 = vadd.f32 %v2981_v58, %v4323_v22  ;;  %v1443_v13 = vpop.f32.mrb[13].mxu1 }
 0x1ed   :  { %v3419_v6 = vpop.eup %3418  ;;  %3438 = vpow2.f32 %v2593_v29  ;;  %v4377_v52 = vadd.f32 %v1443_v13, %v4323_v22 }
 0x1ee   :  { %v3421_v39 = vpop.eup %3420  ;;  %v4380_v32 = vmul.f32 %v3419_v6, %v4326_v1  ;;  %3440 = vpow2.f32 %v2592_v57  ;;  %v2595_v15 = vmul.f32 -1.442695, %v4374_v20 }
 0x1ef   :  { %v3423_v40 = vpop.eup %3422  ;;  %v4384_v47 = vmul.f32 %v3421_v39, %v4329_v21  ;;  %v2594_v44 = vmul.f32 -1.442695, %v4377_v52  ;;  %v2984_v28 = vpop.f32.mrb[14].mxu1 }
 0x1f0   :  { %v3425_v30 = vpop.eup %3424  ;;  %v1901_v61 = vadd.f32 1.0, %v3423_v40  ;;  %3442 = vpow2.f32 %v2595_v15  ;;  %v4388_v19 = vadd.f32 %v2984_v28, %v4323_v22  ;;  %v1453_v60 = vpop.f32.mrb[15].mxu1 }
 0x1f1   :  { %v3427_v49 = vpop.eup %3426  ;;  %v3078_v1 = vpack.c.bf16 %v4380_v32, %v4384_v47  ;;  %v1900_v46 = vadd.f32 1.0, %v3425_v30  ;;  %3444 = vpow2.f32 %v2594_v44  ;;  %v4393_v53 = vadd.f32 %v1453_v60, %v4323_v22 }
 0x1f2   :  { %v3429_v21 = vpop.eup %3428  ;;  %v4396_v8 = vmul.f32 %v3427_v49, %v4334_v55  ;;  %3446 = vrcp.f32 %v1901_v61  ;;  %v2597_v56 = vmul.f32 -1.442695, %v4388_v19 }
 0x1f3   :  { %v3431_v4 = vpop.eup %3430  ;;  %v4400_v59 = vmul.f32 %v3429_v21, %v4337_v2  ;;  %3448 = vrcp.f32 %v1900_v46  ;;  %v2596_v62 = vmul.f32 -1.442695, %v4393_v53  ;;  %v2987_v9 = vpop.f32.mrb[16].mxu1 }
 0x1f4   :  { %v3433_v63 = vpop.eup %3432  ;;  %v1903_v26 = vadd.f32 1.0, %v3431_v4  ;;  %3450 = vpow2.f32 %v2597_v56  ;;  %v4404_v0 = vadd.f32 %v2987_v9, %v4323_v22  ;;  %v1463_v14 = vpop.f32.mrb[17].mxu1 }
 0x1f5   :  { %v3435_v55 = vpop.eup %3434  ;;  %v3082_v3 = vpack.c.bf16 %v4396_v8, %v4400_v59  ;;  %v1902_v38 = vadd.f32 1.0, %v3433_v63  ;;  %3452 = vpow2.f32 %v2596_v62  ;;  %v4409_v2 = vadd.f32 %v1463_v14, %v4323_v22 }
 0x1f6   :  { %v3437_v16 = vpop.eup %3436  ;;  %v4412_v35 = vmul.f32 %v3435_v55, %v4342_v27  ;;  %3454 = vrcp.f32 %v1903_v26  ;;  %v2599_v10 = vmul.f32 -1.442695, %v4404_v0  ;;  %v2153_v27 = vld [vmem:[%s4834_s4 + $0x18] sm:$0xff] }
 0x1f7   :  { %v3439_v23 = vpop.eup %3438  ;;  %v4416_v12 = vmul.f32 %v3437_v16, %v4345_v24  ;;  %3456 = vrcp.f32 %v1902_v38  ;;  %v2598_v42 = vmul.f32 -1.442695, %v4409_v2  ;;  %2288 = vmatprep.mubr.f32.mxu0 %v2153_v27 }
 0x1f8   :  { %v3441_v37 = vpop.eup %3440  ;;  %v1905_v11 = vadd.f32 1.0, %v3439_v23  ;;  %3458 = vpow2.f32 %v2599_v10  ;;  %v2990_v18 = vpop.f32.mrb[18].mxu1 }
 0x1f9   :  { %v3086_v36 = vpack.c.bf16 %v4412_v35, %v4416_v12  ;;  %v1904_v24 = vadd.f32 1.0, %v3441_v37  ;;  %3460 = vpow2.f32 %v2598_v42  ;;  %v4428_v43 = vadd.f32 %v2990_v18, %v4323_v22  ;;  %v1473_v17 = vpop.f32.mrb[19].mxu1 }
 0x1fa   :  { %v3443_v48 = vpop.eup %3442  ;;  %3462 = vrcp.f32 %v1905_v11  ;;  %v4431_v5 = vadd.f32 %v1473_v17, %v4323_v22 }
 0x1fb   :  { %v3445_v41 = vpop.eup %3444  ;;  %3464 = vrcp.f32 %v1904_v24  ;;  %v1907_v51 = vadd.f32 1.0, %v3443_v48  ;;  %v2601_v29 = vmul.f32 -1.442695, %v4428_v43 }
 0x1fc   :  { %v3447_v57 = vpop.eup %3446  ;;  %v1906_v58 = vadd.f32 1.0, %v3445_v41  ;;  %v2600_v13 = vmul.f32 -1.442695, %v4431_v5  ;;  %v2993_v6 = vpop.f32.mrb[20].mxu1 }
 0x1fd   :  { %v3449_v39 = vpop.eup %3448  ;;  %v4436_v15 = vmul.f32 %v3447_v57, %v4350_v31  ;;  %3466 = vrcp.f32 %v1907_v51  ;;  %v4439_v40 = vadd.f32 %v2993_v6, %v4323_v22  ;;  %v1483_v44 = vpop.f32.mrb[21].mxu1 }
 0x1fe   :  { %v3451_v28 = vpop.eup %3450  ;;  %v4442_v30 = vmul.f32 %v3449_v39, %v4353_v7  ;;  %3468 = vrcp.f32 %v1906_v58  ;;  %v4445_v61 = vadd.f32 %v1483_v44, %v4323_v22 }
 0x1ff   :  { %v3453_v60 = vpop.eup %3452  ;;  %v1909_v49 = vadd.f32 1.0, %v3451_v28  ;;  %3470 = vpow2.f32 %v2601_v29  ;;  %v2603_v46 = vmul.f32 -1.442695, %v4439_v40 }
 0x200   :  { %v3455_v31 = vpop.eup %3454  ;;  %v3090_v21 = vpack.c.bf16 %v4436_v15, %v4442_v30  ;;  %v1908_v56 = vadd.f32 1.0, %v3453_v60  ;;  %3472 = vpow2.f32 %v2600_v13  ;;  %v2602_v4 = vmul.f32 -1.442695, %v4445_v61  ;;  %v2996_v62 = vpop.f32.mrb[22].mxu1 }
 0x201   :  { %v3457_v7 = vpop.eup %3456  ;;  %v4452_v9 = vmul.f32 %v3455_v31, %v4358_v34  ;;  %3474 = vrcp.f32 %v1909_v49  ;;  %v4455_v63 = vadd.f32 %v2996_v62, %v4323_v22  ;;  %v1493_v26 = vpop.f32.mrb[23].mxu1 }
 0x202   :  { %v3459_v14 = vpop.eup %3458  ;;  %v4458_v55 = vmul.f32 %v3457_v7, %v4361_v45  ;;  %3476 = vrcp.f32 %v1908_v56  ;;  %v4461_v38 = vadd.f32 %v1493_v26, %v4323_v22 }
 0x203   :  { %v3461_v16 = vpop.eup %3460  ;;  %v1911_v10 = vadd.f32 1.0, %v3459_v14  ;;  %3478 = vpow2.f32 %v2603_v46  ;;  %v2605_v23 = vmul.f32 -1.442695, %v4455_v63 }
 0x204   :  { %v3463_v34 = vpop.eup %3462  ;;  %v3094_v42 = vpack.c.bf16 %v4452_v9, %v4458_v55  ;;  %v1910_v37 = vadd.f32 1.0, %v3461_v16  ;;  %3480 = vpow2.f32 %v2602_v4  ;;  %v2604_v11 = vmul.f32 -1.442695, %v4461_v38  ;;  %v2999_v18 = vpop.f32.mrb[24].mxu1 }
 0x205   :  { %v3465_v45 = vpop.eup %3464  ;;  %v4468_v33 = vmul.f32 %v3463_v34, %v4366_v25  ;;  %3482 = vrcp.f32 %v1911_v10  ;;  %v4471_v27 = vadd.f32 %v2999_v18, %v4323_v22  ;;  %v1503_v24 = vpop.f32.mrb[25].mxu1 }
 0x206   :  { %v4474_v17 = vmul.f32 %v3465_v45, %v4369_v50  ;;  %3484 = vrcp.f32 %v1910_v37  ;;  %v4477_v48 = vadd.f32 %v1503_v24, %v4323_v22 }
 0x207   :  { %v3467_v41 = vpop.eup %3466  ;;  %3486 = vpow2.f32 %v2605_v23  ;;  %v2607_v51 = vmul.f32 -1.442695, %v4471_v27 }
 0x208   :  { %v3469_v29 = vpop.eup %3468  ;;  %v3098_v25 = vpack.c.bf16 %v4468_v33, %v4474_v17  ;;  %v4483_v57 = vmul.f32 %v3467_v41, %v4374_v20  ;;  %3488 = vpow2.f32 %v2604_v11  ;;  %v2606_v58 = vmul.f32 -1.442695, %v4477_v48  ;;  %v3002_v50 = vpop.f32.mrb[26].mxu1 }
 0x209   :  { %v3471_v13 = vpop.eup %3470  ;;  %v4487_v6 = vmul.f32 %v3469_v29, %v4377_v52  ;;  %3490 = vpow2.f32 %v2607_v51  ;;  %v4490_v39 = vadd.f32 %v3002_v50, %v4323_v22  ;;  %v1513_v44 = vpop.f32.mrb[27].mxu1 }
 0x20a   :  { %v3473_v28 = vpop.eup %3472  ;;  %v1913_v60 = vadd.f32 1.0, %v3471_v13  ;;  %3492 = vpow2.f32 %v2606_v58  ;;  %v4493_v49 = vadd.f32 %v1513_v44, %v4323_v22 }
 0x20b   :  { %v3475_v20 = vpop.eup %3474  ;;  %v3102_v46 = vpack.c.bf16 %v4483_v57, %v4487_v6  ;;  %v1912_v31 = vadd.f32 1.0, %v3473_v28  ;;  %v2609_v56 = vmul.f32 -1.442695, %v4490_v39  ;;  %v2294_v57 = vld [vmem:[%s4835_s5] sm:$0xff]  ;;  %v2295_v6 = vld [vmem:[%s4835_s5 + $0x8] sm:$0xff] }
 0x20c   :  { %v3477_v52 = vpop.eup %3476  ;;  %v4499_v4 = vmul.f32 %v3475_v20, %v4388_v19  ;;  %3494 = vrcp.f32 %v1913_v60  ;;  %v2608_v62 = vmul.f32 -1.442695, %v4493_v49  ;;  %v3005_v7 = vpop.f32.mrb[28].mxu1 }
 0x20d   :  { %v3479_v26 = vpop.eup %3478  ;;  %v4503_v14 = vmul.f32 %v3477_v52, %v4393_v53  ;;  %3496 = vrcp.f32 %v1912_v31  ;;  %v4506_v16 = vadd.f32 %v3005_v7, %v4323_v22  ;;  %v1523_v10 = vpop.f32.mrb[29].mxu1 }
 0x20e   :  { %v3481_v23 = vpop.eup %3480  ;;  %v1915_v34 = vadd.f32 1.0, %v3479_v26  ;;  %3498 = vpow2.f32 %v2609_v56  ;;  %v4509_v37 = vadd.f32 %v1523_v10, %v4323_v22 }
 0x20f   :  { %v3483_v19 = vpop.eup %3482  ;;  %v3106_v11 = vpack.c.bf16 %v4499_v4, %v4503_v14  ;;  %v1914_v18 = vadd.f32 1.0, %v3481_v23  ;;  %3500 = vpow2.f32 %v2608_v62  ;;  %v2611_v53 = vmul.f32 -1.442695, %v4506_v16 }
 0x210   :  { %v3485_v45 = vpop.eup %3484  ;;  %v2103_v24 = vmul.f32 %v3483_v19, %v4404_v0  ;;  %3502 = vrcp.f32 %v1915_v34  ;;  %v2610_v41 = vmul.f32 -1.442695, %v4509_v37  ;;  %v3008_v51 = vpop.f32.mrb[30].mxu1 }
 0x211   :  { %v3487_v29 = vpop.eup %3486  ;;  %v2102_v58 = vmul.f32 %v3485_v45, %v4409_v2  ;;  %3504 = vrcp.f32 %v1914_v18  ;;  %v4518_v50 = vadd.f32 %v3008_v51, %v4323_v22  ;;  %v1533_v13 = vpop.f32.mrb[31].mxu1 }
 0x212   :  { %v3489_v44 = vpop.eup %3488  ;;  %v1917_v28 = vadd.f32 1.0, %v3487_v29  ;;  %3506 = vpow2.f32 %v2611_v53  ;;  %v4521_v60 = vadd.f32 %v1533_v13, %v4323_v22 }
 0x213   :  { %v3491_v20 = vpop.eup %3490  ;;  %v1916_v0 = vadd.f32 1.0, %v3489_v44  ;;  %3508 = vpow2.f32 %v2610_v41  ;;  %v3076_v31 = vpack.c.bf16 %v2103_v24, %v2102_v58  ;;  %v2613_v2 = vmul.f32 -1.442695, %v4518_v50 }
 0x214   :  { %v3493_v56 = vpop.eup %3492  ;;  %3510 = vrcp.f32 %v1917_v28  ;;  %v1919_v52 = vadd.f32 1.0, %v3491_v20  ;;  %v3011_v62 = vpop.f32.mrb[32].mxu1  ;;  %v2612_v26 = vmul.f32 -1.442695, %v4521_v60 }
 0x215   :  { %3512 = vrcp.f32 %v1916_v0  ;;  %v1918_v7 = vadd.f32 1.0, %v3493_v56  ;;  %v4526_v10 = vadd.f32 %v3011_v62, %v4323_v22  ;;  %v1543_v23 = vpop.f32.mrb[33].mxu1  ;;  %3077 = vmatprep.subr.bf16.mxu1 %v3076_v31 }
 0x216   :  { %v3495_v34 = vpop.eup %3494  ;;  %3514 = vrcp.f32 %v1919_v52  ;;  %v4529_v19 = vadd.f32 %v1543_v23, %v4323_v22  ;;  %3079 = vmatpush3.bf16.msra.mxu1 %v3078_v1 }
 0x217   :  { %v3497_v18 = vpop.eup %3496  ;;  %v2105_v53 = vmul.f32 %v3495_v34, %v4428_v43  ;;  %3516 = vrcp.f32 %v1918_v7  ;;  %v2615_v45 = vmul.f32 -1.442695, %v4526_v10 }
 0x218   :  { %v3499_v24 = vpop.eup %3498  ;;  %v2104_v41 = vmul.f32 %v3497_v18, %v4431_v5  ;;  %3518 = vpow2.f32 %v2613_v2  ;;  %v3014_v51 = vpop.f32.mrb[34].mxu1  ;;  %v2614_v13 = vmul.f32 -1.442695, %v4529_v19 }
 0x219   :  { %v3501_v29 = vpop.eup %3500  ;;  %v1921_v58 = vadd.f32 1.0, %v3499_v24  ;;  %3520 = vpow2.f32 %v2612_v26  ;;  %v4539_v44 = vadd.f32 %v3014_v51, %v4323_v22  ;;  %v1553_v32 = vpop.f32.mrb[35].mxu1 }
 0x21a   :  { %v3503_v47 = vpop.eup %3502  ;;  %v1920_v1 = vadd.f32 1.0, %v3501_v29  ;;  %3522 = vpow2.f32 %v2615_v45  ;;  %v4542_v43 = vadd.f32 %v1553_v32, %v4323_v22  ;;  %v3080_v28 = vpack.c.bf16 %v2105_v53, %v2104_v41 }
 0x21b   :  { %v3505_v20 = vpop.eup %3504  ;;  %v2107_v5 = vmul.f32 %v3503_v47, %v4439_v40  ;;  %3524 = vrcp.f32 %v1921_v58  ;;  %v2617_v0 = vmul.f32 -1.442695, %v4539_v44 }
 0x21c   :  { %v3507_v31 = vpop.eup %3506  ;;  %v2106_v56 = vmul.f32 %v3505_v20, %v4445_v61  ;;  %3526 = vrcp.f32 %v1920_v1  ;;  %3081 = vmatprep.subr.bf16.mxu1 %v3080_v28  ;;  %v3017_v52 = vpop.f32.mrb[36].mxu1  ;;  %v2616_v7 = vmul.f32 -1.442695, %v4542_v43 }
 0x21d   :  { %v3509_v2 = vpop.eup %3508  ;;  %v1923_v62 = vadd.f32 1.0, %v3507_v31  ;;  %3528 = vpow2.f32 %v2614_v13  ;;  %3083 = vmatpush3.bf16.msra.mxu1 %v3082_v3  ;;  %v4552_v40 = vadd.f32 %v3017_v52, %v4323_v22  ;;  %v1563_v26 = vpop.f32.mrb[37].mxu1 }
 0x21e   :  { %v3511_v23 = vpop.eup %3510  ;;  %v1922_v34 = vadd.f32 1.0, %v3509_v2  ;;  %3530 = vpow2.f32 %v2617_v0  ;;  %v4555_v61 = vadd.f32 %v1563_v26, %v4323_v22  ;;  %v3084_v18 = vpack.c.bf16 %v2107_v5, %v2106_v56 }
 0x21f   :  { %v3513_v53 = vpop.eup %3512  ;;  %v2109_v45 = vmul.f32 %v3511_v23, %v4455_v63  ;;  %3532 = vrcp.f32 %v1923_v62  ;;  %v2619_v24 = vmul.f32 -1.442695, %v4552_v40 }
 0x220   :  { %v3515_v41 = vpop.eup %3514  ;;  %v2108_v8 = vmul.f32 %v3513_v53, %v4461_v38  ;;  %3534 = vrcp.f32 %v1922_v34  ;;  %v2618_v59 = vmul.f32 -1.442695, %v4555_v61  ;;  %3085 = vmatprep.subr.bf16.mxu1 %v3084_v18  ;;  %v3020_v3 = vpop.f32.mrb[38].mxu1 }
 0x221   :  { %v3517_v51 = vpop.eup %3516  ;;  %v2111_v29 = vmul.f32 %v3515_v41, %v4471_v27  ;;  %3536 = vpow2.f32 %v2616_v7  ;;  %3087 = vmatpush3.bf16.msra.mxu1 %v3086_v36  ;;  %v4566_v63 = vadd.f32 %v3020_v3, %v4323_v22  ;;  %v1573_v58 = vpop.f32.mrb[39].mxu1 }
 0x222   :  { %v3519_v13 = vpop.eup %3518  ;;  %v2110_v38 = vmul.f32 %v3517_v51, %v4477_v48  ;;  %3538 = vpow2.f32 %v2619_v24  ;;  %v4570_v32 = vadd.f32 %v1573_v58, %v4323_v22  ;;  %v3088_v47 = vpack.c.bf16 %v2109_v45, %v2108_v8 }
 0x223   :  { %v3521_v1 = vpop.eup %3520  ;;  %v1925_v28 = vadd.f32 1.0, %v3519_v13  ;;  %3540 = vpow2.f32 %v2618_v59  ;;  %v2621_v35 = vmul.f32 -1.442695, %v4566_v63 }
 0x224   :  { %v3523_v27 = vpop.eup %3522  ;;  %v1924_v20 = vadd.f32 1.0, %v3521_v1  ;;  %3089 = vmatprep.subr.bf16.mxu1 %v3088_v47  ;;  %v3023_v12 = vpop.f32.mrb[40].mxu1  ;;  %v3092_v36 = vpack.c.bf16 %v2111_v29, %v2110_v38  ;;  %v2620_v48 = vmul.f32 -1.442695, %v4570_v32 }
 0x225   :  { %v3525_v5 = vpop.eup %3524  ;;  %3542 = vrcp.f32 %v1925_v28  ;;  %v1927_v0 = vadd.f32 1.0, %v3523_v27  ;;  %3091 = vmatpush3.bf16.msra.mxu1 %v3090_v21  ;;  %v4578_v31 = vadd.f32 %v3023_v12, %v4323_v22  ;;  %v1583_v56 = vpop.f32.mrb[41].mxu1 }
 0x226   :  { %v3527_v52 = vpop.eup %3526  ;;  %v2113_v2 = vmul.f32 %v3525_v5, %v4490_v39  ;;  %3544 = vrcp.f32 %v1924_v20  ;;  %v4582_v62 = vadd.f32 %v1583_v56, %v4323_v22  ;;  %3093 = vmatprep.subr.bf16.mxu1 %v3092_v36 }
 0x227   :  { %v3529_v7 = vpop.eup %3528  ;;  %v2112_v26 = vmul.f32 %v3527_v52, %v4493_v49  ;;  %3546 = vrcp.f32 %v1927_v0  ;;  %v2623_v15 = vmul.f32 -1.442695, %v4578_v31 }
 0x228   :  { %v3531_v23 = vpop.eup %3530  ;;  %v1926_v34 = vadd.f32 1.0, %v3529_v7  ;;  %3548 = vpow2.f32 %v2621_v35  ;;  %v2622_v30 = vmul.f32 -1.442695, %v4582_v62  ;;  %v3026_v21 = vpop.f32.mrb[42].mxu1 }
 0x229   :  { %v3533_v18 = vpop.eup %3532  ;;  %v1929_v53 = vadd.f32 1.0, %v3531_v23  ;;  %3550 = vpow2.f32 %v2620_v48  ;;  %3095 = vmatpush3.bf16.msra.mxu1 %v3094_v42  ;;  %v4591_v39 = vadd.f32 %v3026_v21, %v4323_v22  ;;  %v1593_v49 = vpop.f32.mrb[43].mxu1  ;;  %v3096_v45 = vpack.c.bf16 %v2113_v2, %v2112_v26 }
 0x22a   :  { %v3535_v24 = vpop.eup %3534  ;;  %v2115_v41 = vmul.f32 %v3533_v18, %v4506_v16  ;;  %3552 = vrcp.f32 %v1926_v34  ;;  %v4595_v8 = vadd.f32 %v1593_v49, %v4323_v22  ;;  %v3141_v49 = vpack.c.bf16 %v2295_v6, %v2294_v57 }
 0x22b   :  { %v3537_v59 = vpop.eup %3536  ;;  %v2114_v3 = vmul.f32 %v3535_v24, %v4509_v37  ;;  %3554 = vrcp.f32 %v1929_v53  ;;  %3097 = vmatprep.subr.bf16.mxu1 %v3096_v45  ;;  %v2625_v55 = vmul.f32 -1.442695, %v4591_v39 }
 0x22c   :  { %v3539_v51 = vpop.eup %3538  ;;  %v1928_v9 = vadd.f32 1.0, %v3537_v59  ;;  %3556 = vpow2.f32 %v2623_v15  ;;  %v3029_v42 = vpop.f32.mrb[44].mxu1  ;;  %v2624_v47 = vmul.f32 -1.442695, %v4595_v8  ;;  %v3687_v59 = vmov 0.0|0.0  }
 0x22d   :  { %v3541_v29 = vpop.eup %3540  ;;  %v1931_v58 = vadd.f32 1.0, %v3539_v51  ;;  %3558 = vpow2.f32 %v2622_v30  ;;  %3099 = vmatpush3.bf16.msra.mxu1 %v3098_v25  ;;  %v4603_v16 = vadd.f32 %v3029_v42, %v4323_v22  ;;  %v1603_v13 = vpop.f32.mrb[45].mxu1  ;;  %v3100_v37 = vpack.c.bf16 %v2115_v41, %v2114_v3 }
 0x22e   :  { %3560 = vrcp.f32 %v1928_v9  ;;  %v1930_v38 = vadd.f32 1.0, %v3541_v29  ;;  %v4607_v1 = vadd.f32 %v1603_v13, %v4323_v22 }
 0x22f   :  { %v3543_v28 = vpop.eup %3542  ;;  %3562 = vrcp.f32 %v1931_v58  ;;  %v2627_v27 = vmul.f32 -1.442695, %v4603_v16  ;;  %3101 = vmatprep.subr.bf16.mxu1 %v3100_v37 }
 0x230   :  { %v3545_v20 = vpop.eup %3544  ;;  %v2117_v33 = vmul.f32 %v3543_v28, %v4518_v50  ;;  %3564 = vrcp.f32 %v1930_v38  ;;  %v2626_v17 = vmul.f32 -1.442695, %v4607_v1  ;;  %v3032_v25 = vpop.f32.mrb[46].mxu1 }
 0x231   :  { %v3547_v35 = vpop.eup %3546  ;;  %v2116_v12 = vmul.f32 %v3545_v20, %v4521_v60  ;;  %3566 = vpow2.f32 %v2625_v55  ;;  %3103 = vmatpush3.bf16.msra.mxu1 %v3102_v46  ;;  %v4617_v36 = vadd.f32 %v3032_v25, %v4323_v22  ;;  %v1613_v5 = vpop.f32.mrb[47].mxu1 }
 0x232   :  { %v3549_v0 = vpop.eup %3548  ;;  %v4620_v48 = vmul.f32 %v3547_v35, %v4526_v10  ;;  %3568 = vpow2.f32 %v2624_v47  ;;  %v4623_v50 = vadd.f32 %v1613_v5, %v4323_v22 }
 0x233   :  { %v3551_v56 = vpop.eup %3550  ;;  %v1933_v52 = vadd.f32 1.0, %v3549_v0  ;;  %3570 = vpow2.f32 %v2627_v27  ;;  %v2629_v60 = vmul.f32 -1.442695, %v4617_v36  ;;  %v3104_v2 = vpack.c.bf16 %v2117_v33, %v2116_v12 }
 0x234   :  { %v3553_v46 = vpop.eup %3552  ;;  %v1932_v10 = vadd.f32 1.0, %v3551_v56  ;;  %3572 = vpow2.f32 %v2626_v17  ;;  %v2628_v7 = vmul.f32 -1.442695, %v4623_v50  ;;  %v3035_v26 = vpop.f32.mrb[48].mxu1 }
 0x235   :  { %v3555_v23 = vpop.eup %3554  ;;  %v4634_v34 = vmul.f32 %v3553_v46, %v4529_v19  ;;  %3574 = vrcp.f32 %v1933_v52  ;;  %3105 = vmatprep.subr.bf16.mxu1 %v3104_v2  ;;  %v4637_v15 = vadd.f32 %v3035_v26, %v4323_v22  ;;  %v1623_v30 = vpop.f32.mrb[49].mxu1  ;;  %v2150_v19 = vld [vmem:[%s4834_s4] sm:$0xff] }
 0x236   :  { %v3557_v21 = vpop.eup %3556  ;;  %v4640_v18 = vmul.f32 %v3555_v23, %v4539_v44  ;;  %3576 = vrcp.f32 %v1932_v10  ;;  %3107 = vmatpush3.bf16.msra.mxu1 %v3106_v11  ;;  %v4646_v53 = vadd.f32 %v1623_v30, %v4323_v22 }
 0x237   :  { %v3559_v45 = vpop.eup %3558  ;;  %v3110_v24 = vpack.c.bf16 %v4620_v48, %v4634_v34  ;;  %v1935_v41 = vadd.f32 1.0, %v3557_v21  ;;  %3578 = vpow2.f32 %v2629_v60  ;;  %v2631_v44 = vmul.f32 -1.442695, %v4637_v15  ;;  %3140 = vmatprep.subr.bf16.mxu1 %v3687_v59 }
 0x238   :  { %v3561_v4 = vpop.eup %3560  ;;  %v1934_v14 = vadd.f32 1.0, %v3559_v45  ;;  %3580 = vpow2.f32 %v2628_v7  ;;  %v2630_v11 = vmul.f32 -1.442695, %v4646_v53  ;;  %v3038_v3 = vpop.f32.mrb[50].mxu1 }
 0x239   :  { %v3563_v51 = vpop.eup %3562  ;;  %v4656_v9 = vmul.f32 %v3561_v4, %v4542_v43  ;;  %3582 = vrcp.f32 %v1935_v41  ;;  %v4659_v55 = vadd.f32 %v3038_v3, %v4323_v22  ;;  %v1633_v42 = vpop.f32.mrb[51].mxu1  ;;  %2219 = vmatmul.mubr.f32.vlgmr.msra.gmra.mrb[64].mxu1 %v2150_v19 }
 0x23a   :  { %v3565_v29 = vpop.eup %3564  ;;  %v4662_v58 = vmul.f32 %v3563_v51, %v4552_v40  ;;  %3584 = vrcp.f32 %v1934_v14  ;;  %v4665_v13 = vadd.f32 %v1633_v42, %v4323_v22  ;;  %3142 = vmatpush3.bf16.msra.mxu1 %v3141_v49 }
 0x23b   :  { %v3567_v37 = vpop.eup %3566  ;;  %v3114_v43 = vpack.c.bf16 %v4640_v18, %v4656_v9  ;;  %v4670_v38 = vmul.f32 %v3565_v29, %v4555_v61  ;;  %3586 = vpow2.f32 %v2631_v44  ;;  %v2633_v47 = vmul.f32 -1.442695, %v4659_v55  ;;  %3143 = vmatprep.subr.bf16.mxu1 %v3687_v59 }
 0x23c   :  { %v3569_v28 = vpop.eup %3568  ;;  %v1937_v27 = vadd.f32 1.0, %v3567_v37  ;;  %3588 = vpow2.f32 %v2630_v11  ;;  %v3041_v40 = vpop.f32.mrb[52].mxu1  ;;  %v2632_v5 = vmul.f32 -1.442695, %v4665_v13 }
 0x23d   :  { %v3571_v20 = vpop.eup %3570  ;;  %v3118_v33 = vpack.c.bf16 %v4662_v58, %v4670_v38  ;;  %v1936_v17 = vadd.f32 1.0, %v3569_v28  ;;  %3590 = vpow2.f32 %v2633_v47  ;;  %v4676_v25 = vadd.f32 %v3041_v40, %v4323_v22  ;;  %v1643_v35 = vpop.f32.mrb[53].mxu1 }
 0x23e   :  { %v3573_v61 = vpop.eup %3572  ;;  %3592 = vrcp.f32 %v1937_v27  ;;  %v1939_v12 = vadd.f32 1.0, %v3571_v20  ;;  %v4680_v0 = vadd.f32 %v1643_v35, %v4323_v22 }
 0x23f   :  { %v3575_v56 = vpop.eup %3574  ;;  %3594 = vrcp.f32 %v1936_v17  ;;  %v1938_v52 = vadd.f32 1.0, %v3573_v61  ;;  %v2635_v60 = vmul.f32 -1.442695, %v4676_v25 }
 0x240   :  { %v3577_v2 = vpop.eup %3576  ;;  %v4684_v57 = vmul.f32 %v3575_v56, %v4566_v63  ;;  %3596 = vrcp.f32 %v1939_v12  ;;  %v3044_v6 = vpop.f32.mrb[54].mxu1  ;;  %v2634_v21 = vmul.f32 -1.442695, %v4680_v0 }
 0x241   :  { %v3579_v46 = vpop.eup %3578  ;;  %v4687_v10 = vmul.f32 %v3577_v2, %v4570_v32  ;;  %3598 = vrcp.f32 %v1938_v52  ;;  %v4690_v7 = vadd.f32 %v3044_v6, %v4323_v22  ;;  %v1653_v26 = vpop.f32.mrb[55].mxu1 }
 0x242   :  { %v3581_v23 = vpop.eup %3580  ;;  %v1941_v30 = vadd.f32 1.0, %v3579_v46  ;;  %3600 = vpow2.f32 %v2632_v5  ;;  %v4694_v19 = vadd.f32 %v1653_v26, %v4323_v22 }
 0x243   :  { %v3583_v63 = vpop.eup %3582  ;;  %v3122_v49 = vpack.c.bf16 %v4684_v57, %v4687_v10  ;;  %v1940_v45 = vadd.f32 1.0, %v3581_v23  ;;  %3602 = vpow2.f32 %v2635_v60  ;;  %v2637_v32 = vmul.f32 -1.442695, %v4690_v7 }
 0x244   :  { %v3585_v41 = vpop.eup %3584  ;;  %v4700_v44 = vmul.f32 %v3583_v63, %v4578_v31  ;;  %3604 = vrcp.f32 %v1941_v30  ;;  %v3047_v59 = vpop.f32.mrb[56].mxu1 }
 0x245   :  { %v3587_v4 = vpop.eup %3586  ;;  %v4703_v14 = vmul.f32 %v3585_v41, %v4582_v62  ;;  %3606 = vrcp.f32 %v1940_v45  ;;  %v4706_v11 = vadd.f32 %v3047_v59, %v4323_v22  ;;  %v1663_v3 = vpop.f32.mrb[57].mxu1  ;;  %v2636_v62 = vmul.f32 -1.442695, %v4694_v19 }
 0x246   :  { %v3589_v51 = vpop.eup %3588  ;;  %v1943_v42 = vadd.f32 1.0, %v3587_v4  ;;  %3608 = vpow2.f32 %v2634_v21  ;;  %v4709_v29 = vadd.f32 %v1663_v3, %v4323_v22 }
 0x247   :  { %v3591_v37 = vpop.eup %3590  ;;  %v3126_v31 = vpack.c.bf16 %v4700_v44, %v4703_v14  ;;  %v1942_v47 = vadd.f32 1.0, %v3589_v51  ;;  %3610 = vpow2.f32 %v2637_v32  ;;  %v2639_v40 = vmul.f32 -1.442695, %v4706_v11  ;;  %v2152_v44 = vld [vmem:[%s4834_s4 + $0x10] sm:$0xff] }
 0x248   :  { %v3593_v28 = vpop.eup %3592  ;;  %3612 = vrcp.f32 %v1943_v42  ;;  %v1945_v27 = vadd.f32 1.0, %v3591_v37  ;;  %v3050_v20 = vpop.f32.mrb[58].mxu1  ;;  %v2638_v61 = vmul.f32 -1.442695, %v4709_v29  ;;  %v2296_v14 = vld [vmem:[%s4835_s5 + $0x10] sm:$0xff] }
 0x249   :  { %v3595_v17 = vpop.eup %3594  ;;  %v4716_v35 = vmul.f32 %v3593_v28, %v4591_v39  ;;  %3614 = vrcp.f32 %v1942_v47  ;;  %v4720_v12 = vadd.f32 %v3050_v20, %v4323_v22  ;;  %v1673_v5 = vpop.f32.mrb[59].mxu1 }
 0x24a   :  { %v3597_v56 = vpop.eup %3596  ;;  %v4723_v52 = vmul.f32 %v3595_v17, %v4595_v8  ;;  %3616 = vrcp.f32 %v1945_v27  ;;  %v4726_v60 = vadd.f32 %v1673_v5, %v4323_v22 }
 0x24b   :  { %v3599_v2 = vpop.eup %3598  ;;  %v4729_v6 = vmul.f32 %v3597_v56, %v4603_v16  ;;  %3618 = vpow2.f32 %v2636_v62  ;;  %v2641_v39 = vmul.f32 -1.442695, %v4720_v12 }
 0x24c   :  { %v3601_v46 = vpop.eup %3600  ;;  %v3130_v26 = vpack.c.bf16 %v4716_v35, %v4723_v52  ;;  %v4735_v23 = vmul.f32 %v3599_v2, %v4607_v1  ;;  %3620 = vpow2.f32 %v2639_v40  ;;  %v3053_v8 = vpop.f32.mrb[60].mxu1  ;;  %v2640_v63 = vmul.f32 -1.442695, %v4726_v60 }
 0x24d   :  { %v3603_v30 = vpop.eup %3602  ;;  %v1944_v21 = vadd.f32 1.0, %v3601_v46  ;;  %3622 = vpow2.f32 %v2638_v61  ;;  %v4739_v16 = vadd.f32 %v3053_v8, %v4323_v22  ;;  %v1683_v45 = vpop.f32.mrb[61].mxu1  ;;  %v3689_v52 = vmov 0.0  }
 0x24e   :  { %v3605_v32 = vpop.eup %3604  ;;  %v3134_v41 = vpack.c.bf16 %v4729_v6, %v4735_v23  ;;  %v1947_v59 = vadd.f32 1.0, %v3603_v30  ;;  %3624 = vpow2.f32 %v2641_v39  ;;  %v4744_v1 = vadd.f32 %v1683_v45, %v4323_v22  ;;  %3065 = vmatprep.mubr.msk.f32.mxu1 %vm3688_vm2, %v3689_v52 }
 0x24f   :  { %v3607_v4 = vpop.eup %3606  ;;  %v4747_v3 = vmul.f32 %v3605_v32, %v4617_v36  ;;  %3626 = vrcp.f32 %v1944_v21  ;;  %v2643_v51 = vmul.f32 -1.442695, %v4739_v16 }
 0x250   :  { %v3609_v42 = vpop.eup %3608  ;;  %v4751_v37 = vmul.f32 %v3607_v4, %v4623_v50  ;;  %3628 = vrcp.f32 %v1947_v59  ;;  %v3056_v47 = vpop.f32.mrb[62].mxu1  ;;  %v2642_v27 = vmul.f32 -1.442695, %v4744_v1 }
 0x251   :  { %v3611_v62 = vpop.eup %3610  ;;  %v1946_v28 = vadd.f32 1.0, %v3609_v42  ;;  %3630 = vpow2.f32 %v2640_v63  ;;  %v4755_v40 = vadd.f32 %v3056_v47, %v4323_v22  ;;  %v1693_v20 = vpop.f32.mrb[63].mxu1 }
 0x252   :  { %v3613_v36 = vpop.eup %3612  ;;  %v3138_v17 = vpack.c.bf16 %v4747_v3, %v4751_v37  ;;  %v1949_v61 = vadd.f32 1.0, %v3611_v62  ;;  %3632 = vpow2.f32 %v2643_v51  ;;  %v4760_v50 = vadd.f32 %v1693_v20, %v4323_v22 }
 0x253   :  { %v3615_v5 = vpop.eup %3614  ;;  %v2135_v56 = vmul.f32 %v3613_v36, %v4637_v15  ;;  %3634 = vrcp.f32 %v1946_v28  ;;  %v2645_v2 = vmul.f32 -1.442695, %v4755_v40  ;;  %v2300_v37 = vsub.s32 1, %v4317_v54 }
 0x254   :  { %v3617_v39 = vpop.eup %3616  ;;  %v2134_v46 = vmul.f32 %v3615_v5, %v4646_v53  ;;  %3636 = vrcp.f32 %v1949_v61  ;;  %v2644_v8 = vmul.f32 -1.442695, %v4760_v50 }
 0x255   :  { %v3619_v30 = vpop.eup %3618  ;;  %3638 = vpow2.f32 %v2642_v27  ;;  %v2137_v15 = vmul.f32 %v3617_v39, %v4659_v55 }
 0x256   :  { %v3621_v21 = vpop.eup %3620  ;;  %v1948_v63 = vadd.f32 1.0, %v3619_v30  ;;  %3640 = vpow2.f32 %v2645_v2  ;;  %v3108_v45 = vpack.c.bf16 %v2135_v56, %v2134_v46 }
 0x257   :  { %v3623_v22 = vpop.eup %3622  ;;  %v1951_v32 = vadd.f32 1.0, %v3621_v21  ;;  %3642 = vpow2.f32 %v2644_v8 }
 0x258   :  { %v3625_v59 = vpop.eup %3624  ;;  %3644 = vrcp.f32 %v1948_v63  ;;  %v1950_v4 = vadd.f32 1.0, %v3623_v22  ;;  %3109 = vmatprep.subr.bf16.mxu0 %v3108_v45 }
 0x259   :  { %v3627_v51 = vpop.eup %3626  ;;  %3646 = vrcp.f32 %v1951_v32  ;;  %v1953_v53 = vadd.f32 1.0, %v3625_v59  ;;  %3111 = vmatpush3.bf16.msra.mxu0 %v3110_v24 }
 0x25a   :  { %v3629_v42 = vpop.eup %3628  ;;  %v2136_v47 = vmul.f32 %v3627_v51, %v4665_v13  ;;  %3648 = vrcp.f32 %v1950_v4 }
 0x25b   :  { %v3631_v62 = vpop.eup %3630  ;;  %3650 = vrcp.f32 %v1953_v53  ;;  %v2139_v27 = vmul.f32 %v3629_v42, %v4676_v25 }
 0x25c   :  { %v3633_v28 = vpop.eup %3632  ;;  %v1952_v55 = vadd.f32 1.0, %v3631_v62  ;;  %v3112_v20 = vpack.c.bf16 %v2137_v15, %v2136_v47 }
 0x25d   :  { %v3635_v36 = vpop.eup %3634  ;;  %v1955_v61 = vadd.f32 1.0, %v3633_v28 }
 0x25e   :  { %v3637_v5 = vpop.eup %3636  ;;  %v2138_v56 = vmul.f32 %v3635_v36, %v4680_v0  ;;  %3652 = vrcp.f32 %v1952_v55  ;;  %3113 = vmatprep.subr.bf16.mxu0 %v3112_v20 }
 0x25f   :  { %v3639_v48 = vpop.eup %3638  ;;  %3654 = vrcp.f32 %v1955_v61  ;;  %3115 = vmatpush3.bf16.msra.mxu0 %v3114_v43  ;;  %v2141_v25 = vmul.f32 %v3637_v5, %v4690_v7 }
 0x260   :  { %v3641_v34 = vpop.eup %3640  ;;  %v1954_v24 = vadd.f32 1.0, %v3639_v48  ;;  %v3116_v13 = vpack.c.bf16 %v2139_v27, %v2138_v56 }
 0x261   :  { %v3643_v2 = vpop.eup %3642  ;;  %v1957_v39 = vadd.f32 1.0, %v3641_v34 }
 0x262   :  { %v3645_v46 = vpop.eup %3644  ;;  %3656 = vrcp.f32 %v1954_v24  ;;  %v1956_v8 = vadd.f32 1.0, %v3643_v2  ;;  %3117 = vmatprep.subr.bf16.mxu0 %v3116_v13 }
 0x263   :  { %v3647_v0 = vpop.eup %3646  ;;  %v2140_v30 = vmul.f32 %v3645_v46, %v4694_v19  ;;  %3658 = vrcp.f32 %v1957_v39  ;;  %3119 = vmatpush3.bf16.msra.mxu0 %v3118_v33 }
 0x264   :  { %v3649_v18 = vpop.eup %3648  ;;  %v2143_v9 = vmul.f32 %v3647_v0, %v4706_v11  ;;  %3660 = vrcp.f32 %v1956_v8 }
 0x265   :  { %v3651_v43 = vpop.eup %3650  ;;  %v2142_v7 = vmul.f32 %v3649_v18, %v4709_v29  ;;  %v3120_v21 = vpack.c.bf16 %v2141_v25, %v2140_v30 }
 0x266   :  { %v2145_v63 = vmul.f32 %v3651_v43, %v4720_v12 }
 0x267   :  { %3121 = vmatprep.subr.bf16.mxu0 %v3120_v21  ;;  %v3124_v45 = vpack.c.bf16 %v2143_v9, %v2142_v7 }
 0x268   :  { %v3653_v22 = vpop.eup %3652  ;;  %3123 = vmatpush3.bf16.msra.mxu0 %v3122_v49 }
 0x269   :  { %v3655_v19 = vpop.eup %3654  ;;  %v2144_v58 = vmul.f32 %v3653_v22, %v4726_v60  ;;  %3125 = vmatprep.subr.bf16.mxu0 %v3124_v45 }
 0x26a   :  { %v2147_v38 = vmul.f32 %v3655_v19, %v4739_v16 }
 0x26b   :  { %v3128_v33 = vpack.c.bf16 %v2145_v63, %v2144_v58 }
 0x26c   :  { %v3657_v11 = vpop.eup %3656  ;;  %3127 = vmatpush3.bf16.msra.mxu0 %v3126_v31  ;;  %v2297_v31 = vld [vmem:[%s4835_s5 + $0x18] sm:$0xff]  ;;  %s3690_s5 = smov [#allocation2]  }
 0x26d   :  { %v3659_v29 = vpop.eup %3658  ;;  %v2146_v12 = vmul.f32 %v3657_v11, %v4744_v1  ;;  %3129 = vmatprep.subr.bf16.mxu0 %v3128_v33  ;;  %v3144_v35 = vpack.c.bf16 %v2297_v31, %v2296_v14  ;;  %s2382_s26 = sshll.u32 %s3690_s5, 4  ;;  %s2383_s26 = int_to_ptr.vmem [resolvable:$true] %s2382_s26 }
 0x26e   :  { %v3661_v32 = vpop.eup %3660  ;;  %v2149_v57 = vmul.f32 %v3659_v29, %v4755_v40  ;;  %v3662_v40 = vld [vmem:[%s4833_s3] sm:$0x3]  ;;  %s3663_s27 = scalar_lea.vmem %s2383_s26, 128  ;;  %p3668_p1 = scmp.lt.s32.totalorder %s2383_s26, %s2383_s26 }
 0x26f   :  { %v2148_v10 = vmul.f32 %v3661_v32, %v4760_v50  ;;  %v3132_v49 = vpack.c.bf16 %v2147_v38, %v2146_v12  ;;  %3145 = vmatpush3.bf16.msra.mxu1 %v3144_v35  ;;  %p3664_p0 = scmp.ne.s32.totalorder %s2383_s26, %s3663_s27  ;;  %p3669_p2 = scmp.lt.s32.totalorder %s3663_s27, %s3663_s27 }
 0x270   :  { %3131 = vmatpush3.bf16.msra.mxu0 %v3130_v26 }
 0x271   :  { %3133 = vmatprep.subr.bf16.mxu0 %v3132_v49  ;;  %v3136_v60 = vpack.c.bf16 %v2149_v57, %v2148_v10  ;;  %p3670_p3 = por %p3669_p2, %p3668_p1 }
 0x273   :  { %p3671_p4 = pnand %p3670_p3, %p3664_p0 }
 0x274   :  { %3135 = vmatpush3.bf16.msra.mxu0 %v3134_v41 }
 0x275   :  { %3137 = vmatprep.subr.bf16.mxu0 %v3136_v60 }
 0x278   :  { %3139 = vmatpush3.bf16.msra.mxu0 %v3138_v17  ;;  %v2301_v17 = vrot.slane %v3662_v40, %v2300_v37 }
 0x27b   :  { %2289 = vmatmul.mubr.f32.vlgmr.msra.gmra.mrb[64].mxu0 %v2152_v44 }
 0x30c   :  { %v2812_v6 = vpop.f32.mrb[64].mxu1 }
 0x30d   :  { %v2813_v26 = vpop.f32.mrb[65].mxu1 }
 0x30e   :  { %v2814_v23 = vadd.f32 %v2813_v26, %v2812_v6 }
 0x34e   :  { %v2847_v16 = vpop.f32.mrb[64].mxu0 }
 0x34f   :  { %v2848_v41 = vpop.f32.mrb[65].mxu0 }
 0x350   :  { %v2849_v1 = vadd.f32 %v2848_v41, %v2847_v16 }
 0x352   :  { %v2291_v3 = vadd.f32 %v2849_v1, %v2814_v23 }
 0x354   :  { %3066 = vmatmul.mubr.msk.f32.vlgmr.msra.gmra.mrb[66].mxu1 %vm93_vm0, %v2291_v3 }
 0x427   :  { %v2371_v50 = vpop.f32.mrb[66].mxu1 }
 0x428   :  { %v2372_v59 = vadd.f32 %v2371_v50, %v2301_v17  ;;  %v3067_v15 = vpop.f32.mrb[67].mxu1 }
 0x42a   :  { %2375 = vst [vmem:[#allocation2] sm:$0xff] %v2372_v59 }
 0x42b   :  { %3674 = shalt.err (!%p3671_p4)
}
 0x42c   :  { %s3675_s30 = scalar_lea.hbm %s4836_s6, 128 }
 0x42d   :  { %p3676_p5 = scmp.ne.s32.totalorder %s4836_s6, %s3675_s30  ;;  %p3679_p6 = scmp.lt.u32.totalorder %s3675_s30, %s4836_s6 }
 0x42f   :  { %p3681_p7 = pnand %p3679_p6, %p3676_p5 }
 0x431   :  { %3684 = shalt.err (!%p3681_p7)
}
 0x432   :  { %2385 = dma.vmem_to_hbm [thread:$0]  %s2383_s26, 128, %s4836_s6, [#allocation3]  }
 0x433   :  { %3685 = dma.done.wait [#allocation3], 128  }
 0x434   :  { %3686 = vsyncadd [#allocation3], 4294967168 }
 0x435   :  { %2389 = vsyncpa [#allocation3], 1 }

</bundles_post_ra>
